<compile_context>
chip_gen: v7x
topology: tpu7x:2x2x1
jax: 0.10.0
libtpu: 0.0.40
codegen_flags: <defaults>
</compile_context>

<pallas_src>
import functools

import jax
import jax.numpy as jnp
import numpy as np
from jax.experimental import pallas as pl
from jax.experimental.pallas import tpu as pltpu

BN_EPS = 1e-5
LANE = 128


def _round_up(x, m):
    return (x + m - 1) // m * m


def _pick_tr(h, w, npk, acc_budget_bytes=64 * 1024):
    """Largest divisor of h keeping the f32 accumulator (TR*W, Npk) <= budget.

    64 KiB (<= 1/4 of the 256 KiB vreg file) leaves headroom for the LHS slab
    and epilogue temporaries, avoiding regalloc spills.
    """
    rows_max = max(1, acc_budget_bytes // (npk * 4))
    tr_max = max(1, rows_max // max(w, 1))
    best = 1
    for d in range(1, min(h, tr_max) + 1):
        if h % d == 0:
            best = d
    return best


def _upconv_kernel(x_ref, w_ref, shift_ref, o_ref, *, tr, w_dim, cin, npk):
    """Fused {nearest-2x upsample + 3x3 conv + BN(eval) + ReLU} for one row tile.

    x_ref     : (H+2, W+2, Cin)  bf16  zero-padded NHWC image (one batch elem)
    w_ref     : (9, Cin, Npk)    bf16  per-offset weights; 4 phases packed on
                                       the lane axis, BN scale folded in
    shift_ref : (1, Npk)         f32   beta - mean*scale + bias*scale (packed)
    o_ref     : (TR, W, Npk)     bf16  phase-packed output row tile
    """
    r = pl.program_id(1)
    row0 = pl.multiple_of(r * tr, tr)

    acc = jnp.zeros((tr * w_dim, npk), jnp.float32)
    # 9 distinct shifted slabs; each built once (one relayout copy) and
    # consumed by one accumulating MXU dot -- no per-phase rebuilds.
    for oy in range(3):
        for ox in range(3):
            lhs = x_ref[pl.ds(row0 + oy, tr), ox:ox + w_dim, :]
            lhs = lhs.reshape(tr * w_dim, cin)
            acc += jnp.dot(lhs, w_ref[oy * 3 + ox],
                           preferred_element_type=jnp.float32)

    y = jnp.maximum(acc + shift_ref[...], 0.0)          # BN shift + ReLU (f32)
    o_ref[...] = y.reshape(tr, w_dim, npk).astype(o_ref.dtype)


def upsampling_conv_block_4l_packed(x_nhwc, p, *,
                                    vmem_limit_bytes=48 * 1024 * 1024):
    """One UpsamplingConvBlock4L with phase-packed output.

    x_nhwc : (N, H, W, Cin) NHWC float
    returns: (packed, Cout) where packed is (N, H, W, Npk) bf16 and the output
             pixel (2a+pi, 2b+pj, co) lives at packed[n, a, b, (pi*2+pj)*Cout+co];
             lanes >= 4*Cout are zero padding.
    """
    N, H, W, Cin = x_nhwc.shape
    Cout = p["w"].shape[0]
    Npk = _round_up(4 * Cout, LANE)        # phase-packed padding (not per-phase)
    TR = _pick_tr(H, W, Npk)

    # ---- parameter folding (tiny, traced once) ------------------------------
    # Upsample(2, nearest) + conv3x3(pad=1): for each output phase (pi, pj),
    #   y[2a+pi, 2b+pj] = sum_{dy,dx} w3[:,:,dy,dx] . x_pad[a+oy, b+ox]
    #   with oy = (pi+dy-1)//2 + 1, ox = (pj+dx-1)//2 + 1   (floor division).
    # Regrouped by (oy, ox): 9 offsets, each feeding every phase it touches,
    # with BN scale folded into the weights.
    w3 = p["w"].astype(jnp.float32)                          # (Cout, Cin, 3, 3)
    scale = p["gamma"] / jnp.sqrt(p["running_var"] + BN_EPS)
    shift = p["beta"] - p["running_mean"] * scale + p["b"] * scale
    w_scaled = w3 * scale[:, None, None, None]               # BN scale folded

    w_off = jnp.zeros((3, 3, Cin, Npk), jnp.float32)
    for pi in range(2):
        for pj in range(2):
            base = (pi * 2 + pj) * Cout
            for dy in range(3):
                for dx in range(3):
                    oy = (pi + dy - 1) // 2 + 1
                    ox = (pj + dx - 1) // 2 + 1
                    w_off = w_off.at[oy, ox, :, base:base + Cout].add(
                        w_scaled[:, :, dy, dx].T)
    w_all = w_off.reshape(9, Cin, Npk).astype(jnp.bfloat16)

    shift_p = jnp.zeros((1, Npk), jnp.float32).at[0, :4 * Cout].set(
        jnp.tile(shift, 4))

    # ---- input: 1-pixel zero halo, bf16 for the MXU -------------------------
    # jnp.pad fuses with the entry NCHW->NHWC transpose / bf16 cast under jit.
    # TODO(synk): for large H*W (esp. v7x, 64 MiB VMEM/TC) switch the input
    # BlockSpec to a halo row tile (TR+2 rows, manual make_async_copy) instead
    # of holding the full padded image in VMEM per batch element.
    x_pad = jnp.pad(x_nhwc.astype(jnp.bfloat16),
                    ((0, 0), (1, 1), (1, 1), (0, 0)))        # (N, H+2, W+2, Cin)

    kernel = functools.partial(_upconv_kernel, tr=TR, w_dim=W, cin=Cin, npk=Npk)
    out_pk = pl.pallas_call(
        kernel,
        out_shape=jax.ShapeDtypeStruct((N, H, W, Npk), jnp.bfloat16),
        grid=(N, H // TR),
        in_specs=[
            # Full padded image per batch element; block index is constant in
            # r, so it is DMA'd once per n and reused across row tiles.
            pl.BlockSpec((None, H + 2, W + 2, Cin), lambda n, r: (n, 0, 0, 0)),
            pl.BlockSpec((9, Cin, Npk), lambda n, r: (0, 0, 0)),
            pl.BlockSpec((1, Npk), lambda n, r: (0, 0)),
        ],
        out_specs=pl.BlockSpec((None, TR, W, Npk), lambda n, r: (n, r, 0, 0)),
        compiler_params=pltpu.CompilerParams(
            dimension_semantics=("parallel", "parallel"),
            # Demo usage is tiny; for production shapes re-budget per
            # generation (v5e/v6e: up to ~96 MiB, v7x: keep <= ~48 MiB/TC).
            vmem_limit_bytes=vmem_limit_bytes),
    )(x_pad, w_all, shift_p)
    return out_pk, Cout


def decoder_block(x_nchw, params_list):
    """DecoderBlock.forward: NCHW in -> NCHW f32 out (NHWC bf16 internally)."""
    x = jnp.transpose(x_nchw, (0, 2, 3, 1))                  # NCHW -> NHWC once
    y = None
    for i, p in enumerate(params_list):
        packed, cout = upsampling_conv_block_4l_packed(x, p)
        n, h, w, _ = packed.shape
        phases = packed[..., :4 * cout].reshape(n, h, w, 2, 2, cout)
        if i + 1 < len(params_list):
            # NHWC depth-to-space for the next layer (single transpose).
            # TODO(synk): for deeper stacks, keep the phase-packed layout
            # between layers and fold the un-pack into the next layer's
            # index_map to avoid this activation round trip.
            x = jnp.transpose(phases, (0, 1, 3, 2, 4, 5)).reshape(
                n, 2 * h, 2 * w, cout)
        else:
            # Final layer: fuse depth-to-space with the mandatory NHWC->NCHW
            # conversion into a single transpose.
            y = jnp.transpose(phases, (0, 5, 1, 3, 2, 4)).reshape(
                n, cout, 2 * h, 2 * w)
    return y.astype(jnp.float32)


def init_params(key, cin, cout):
    """Deterministic synthetic parameters (PyTorch-like shapes)."""
    k1, k2, k3, k4, k5, k6 = jax.random.split(key, 6)
    bound = 1.0 / np.sqrt(cin * 9)
    return dict(
        w=jax.random.uniform(k1, (cout, cin, 3, 3), jnp.float32, -bound, bound),
        b=jax.random.uniform(k2, (cout,), jnp.float32, -bound, bound),
        gamma=jax.random.uniform(k3, (cout,), jnp.float32, 0.5, 1.5),
        beta=jax.random.uniform(k4, (cout,), jnp.float32, -0.5, 0.5),
        running_mean=0.1 * jax.random.normal(k5, (cout,), jnp.float32),
        running_var=jax.random.uniform(k6, (cout,), jnp.float32, 0.5, 1.5),
    )


def _reference(x_nchw, p):
    """Pure-JAX f32 reference (upsample -> conv -> BN(eval) -> ReLU)."""
    x = jnp.transpose(x_nchw, (0, 2, 3, 1))
    x = jnp.repeat(jnp.repeat(x, 2, axis=1), 2, axis=2)
    w_hwio = jnp.transpose(p["w"], (2, 3, 1, 0))
    y = jax.lax.conv_general_dilated(
        x, w_hwio, (1, 1), "SAME",
        dimension_numbers=("NHWC", "HWIO", "NHWC"))
    y = y + p["b"]
    scale = p["gamma"] / jnp.sqrt(p["running_var"] + BN_EPS)
    shift = p["beta"] - p["running_mean"] * scale
    y = jnp.maximum(y * scale + shift, 0.0)
    return jnp.transpose(y, (0, 3, 1, 2))


if __name__ == "__main__":
    key = jax.random.PRNGKey(0)
    kx, kp = jax.random.split(key)

    channels = (4, 8)                                    # DecoderBlock(channels)
    x = jax.random.normal(kx, (2, channels[0], 16, 16), jnp.float32)
    params = [init_params(kp, channels[0], channels[1])]

    fwd = jax.jit(decoder_block)
    y = jax.block_until_ready(fwd(x, params))

    assert y.shape == (2, channels[1], 32, 32), y.shape
    y_ref = jax.block_until_ready(_reference(x, params[0]))

    # bf16 MXU inputs (f32 accumulate) vs. a pure-f32 reference: expect ~1e-2
    # relative deviation; structural bugs (wrong taps/phases) would be ~O(0.5).
    diff = np.abs(np.asarray(y) - np.asarray(y_ref))
    assert diff.mean() < 2e-2, diff.mean()
    np.testing.assert_allclose(np.asarray(y), np.asarray(y_ref),
                               rtol=5e-2, atol=5e-2)
    print("KERNEL_OK")
</pallas_src>

<mosaic_0001>
module attributes {stable_mosaic.version = 11 : i64} {
  func.func @_upconv_kernel(%arg0: i32, %arg1: i32, %arg2: memref<1x18x18x4xbf16, #tpu.memory_space<vmem>>, %arg3: memref<9x4x128xbf16, #tpu.memory_space<vmem>>, %arg4: memref<1x128xf32, #tpu.memory_space<vmem>>, %arg5: memref<1x8x16x128xbf16, #tpu.memory_space<vmem>>) attributes {dimension_semantics = [#tpu.dimension_semantics<parallel>, #tpu.dimension_semantics<parallel>], iteration_bounds = array<i64: 2, 2>, scalar_prefetch = 0 : i64, scratch_operands = 0 : i64, tpu.core_type = #tpu.core_type<tc>, window_params = [{transform_indices = @transform_0, window_bounds = array<i64: 1, 18, 18, 4>}, {pipeline_mode = #tpu.pipeline_mode<synchronous>, transform_indices = @transform_1, window_bounds = array<i64: 9, 4, 128>}, {pipeline_mode = #tpu.pipeline_mode<synchronous>, transform_indices = @transform_2, window_bounds = array<i64: 1, 128>}, {transform_indices = @transform_3, window_bounds = array<i64: 1, 8, 16, 128>}]} {
    %c8_i32 = arith.constant 8 : i32
    %0 = arith.muli %arg1, %c8_i32 : i32
    %1 = tpu.assume_multiple %0, 8 : i32
    %cst = arith.constant 0.000000e+00 : f32
    %2 = vector.broadcast %cst : f32 to vector<128x128xf32>
    %c0_i32 = arith.constant 0 : i32
    %3 = arith.addi %1, %c0_i32 : i32
    %c0 = arith.constant 0 : index
    %4 = arith.index_cast %3 : i32 to index
    %c0_0 = arith.constant 0 : index
    %c0_1 = arith.constant 0 : index
    %5 = vector.load %arg2[%c0, %4, %c0_0, %c0_1] : memref<1x18x18x4xbf16, #tpu.memory_space<vmem>>, vector<1x8x16x4xbf16>
    %6 = vector.shape_cast %5 : vector<1x8x16x4xbf16> to vector<8x16x4xbf16>
    %7 = vector.shape_cast %6 : vector<8x16x4xbf16> to vector<128x4xbf16>
    %c0_2 = arith.constant 0 : index
    %c0_3 = arith.constant 0 : index
    %c0_4 = arith.constant 0 : index
    %8 = vector.load %arg3[%c0_2, %c0_3, %c0_4] : memref<9x4x128xbf16, #tpu.memory_space<vmem>>, vector<1x4x128xbf16>
    %9 = vector.shape_cast %8 : vector<1x4x128xbf16> to vector<4x128xbf16>
    %cst_5 = arith.constant dense<0.000000e+00> : vector<128x128xf32>
    %10 = tpu.matmul %7, %9, %cst_5 {dimension_numbers = #tpu.dot_dimension_numbers<[1], [0], [0], [1], [0, 0, 1, 1], [], []>} : vector<128x4xbf16>, vector<4x128xbf16>, vector<128x128xf32> -> vector<128x128xf32>
    %11 = arith.addf %2, %10 : vector<128x128xf32>
    %c0_i32_6 = arith.constant 0 : i32
    %12 = arith.addi %1, %c0_i32_6 : i32
    %c0_7 = arith.constant 0 : index
    %13 = arith.index_cast %12 : i32 to index
    %c1 = arith.constant 1 : index
    %c0_8 = arith.constant 0 : index
    %14 = vector.load %arg2[%c0_7, %13, %c1, %c0_8] : memref<1x18x18x4xbf16, #tpu.memory_space<vmem>>, vector<1x8x16x4xbf16>
    %15 = vector.shape_cast %14 : vector<1x8x16x4xbf16> to vector<8x16x4xbf16>
    %16 = vector.shape_cast %15 : vector<8x16x4xbf16> to vector<128x4xbf16>
    %c1_9 = arith.constant 1 : index
    %c0_10 = arith.constant 0 : index
    %c0_11 = arith.constant 0 : index
    %17 = vector.load %arg3[%c1_9, %c0_10, %c0_11] : memref<9x4x128xbf16, #tpu.memory_space<vmem>>, vector<1x4x128xbf16>
    %18 = vector.shape_cast %17 : vector<1x4x128xbf16> to vector<4x128xbf16>
    %cst_12 = arith.constant dense<0.000000e+00> : vector<128x128xf32>
    %19 = tpu.matmul %16, %18, %cst_12 {dimension_numbers = #tpu.dot_dimension_numbers<[1], [0], [0], [1], [0, 0, 1, 1], [], []>} : vector<128x4xbf16>, vector<4x128xbf16>, vector<128x128xf32> -> vector<128x128xf32>
    %20 = arith.addf %11, %19 : vector<128x128xf32>
    %c0_i32_13 = arith.constant 0 : i32
    %21 = arith.addi %1, %c0_i32_13 : i32
    %c0_14 = arith.constant 0 : index
    %22 = arith.index_cast %21 : i32 to index
    %c2 = arith.constant 2 : index
    %c0_15 = arith.constant 0 : index
    %23 = vector.load %arg2[%c0_14, %22, %c2, %c0_15] : memref<1x18x18x4xbf16, #tpu.memory_space<vmem>>, vector<1x8x16x4xbf16>
    %24 = vector.shape_cast %23 : vector<1x8x16x4xbf16> to vector<8x16x4xbf16>
    %25 = vector.shape_cast %24 : vector<8x16x4xbf16> to vector<128x4xbf16>
    %c2_16 = arith.constant 2 : index
    %c0_17 = arith.constant 0 : index
    %c0_18 = arith.constant 0 : index
    %26 = vector.load %arg3[%c2_16, %c0_17, %c0_18] : memref<9x4x128xbf16, #tpu.memory_space<vmem>>, vector<1x4x128xbf16>
    %27 = vector.shape_cast %26 : vector<1x4x128xbf16> to vector<4x128xbf16>
    %cst_19 = arith.constant dense<0.000000e+00> : vector<128x128xf32>
    %28 = tpu.matmul %25, %27, %cst_19 {dimension_numbers = #tpu.dot_dimension_numbers<[1], [0], [0], [1], [0, 0, 1, 1], [], []>} : vector<128x4xbf16>, vector<4x128xbf16>, vector<128x128xf32> -> vector<128x128xf32>
    %29 = arith.addf %20, %28 : vector<128x128xf32>
    %c1_i32 = arith.constant 1 : i32
    %30 = arith.addi %1, %c1_i32 : i32
    %c0_20 = arith.constant 0 : index
    %31 = arith.index_cast %30 : i32 to index
    %c0_21 = arith.constant 0 : index
    %c0_22 = arith.constant 0 : index
    %32 = vector.load %arg2[%c0_20, %31, %c0_21, %c0_22] : memref<1x18x18x4xbf16, #tpu.memory_space<vmem>>, vector<1x8x16x4xbf16>
    %33 = vector.shape_cast %32 : vector<1x8x16x4xbf16> to vector<8x16x4xbf16>
    %34 = vector.shape_cast %33 : vector<8x16x4xbf16> to vector<128x4xbf16>
    %c3 = arith.constant 3 : index
    %c0_23 = arith.constant 0 : index
    %c0_24 = arith.constant 0 : index
    %35 = vector.load %arg3[%c3, %c0_23, %c0_24] : memref<9x4x128xbf16, #tpu.memory_space<vmem>>, vector<1x4x128xbf16>
    %36 = vector.shape_cast %35 : vector<1x4x128xbf16> to vector<4x128xbf16>
    %cst_25 = arith.constant dense<0.000000e+00> : vector<128x128xf32>
    %37 = tpu.matmul %34, %36, %cst_25 {dimension_numbers = #tpu.dot_dimension_numbers<[1], [0], [0], [1], [0, 0, 1, 1], [], []>} : vector<128x4xbf16>, vector<4x128xbf16>, vector<128x128xf32> -> vector<128x128xf32>
    %38 = arith.addf %29, %37 : vector<128x128xf32>
    %c1_i32_26 = arith.constant 1 : i32
    %39 = arith.addi %1, %c1_i32_26 : i32
    %c0_27 = arith.constant 0 : index
    %40 = arith.index_cast %39 : i32 to index
    %c1_28 = arith.constant 1 : index
    %c0_29 = arith.constant 0 : index
    %41 = vector.load %arg2[%c0_27, %40, %c1_28, %c0_29] : memref<1x18x18x4xbf16, #tpu.memory_space<vmem>>, vector<1x8x16x4xbf16>
    %42 = vector.shape_cast %41 : vector<1x8x16x4xbf16> to vector<8x16x4xbf16>
    %43 = vector.shape_cast %42 : vector<8x16x4xbf16> to vector<128x4xbf16>
    %c4 = arith.constant 4 : index
    %c0_30 = arith.constant 0 : index
    %c0_31 = arith.constant 0 : index
    %44 = vector.load %arg3[%c4, %c0_30, %c0_31] : memref<9x4x128xbf16, #tpu.memory_space<vmem>>, vector<1x4x128xbf16>
    %45 = vector.shape_cast %44 : vector<1x4x128xbf16> to vector<4x128xbf16>
    %cst_32 = arith.constant dense<0.000000e+00> : vector<128x128xf32>
    %46 = tpu.matmul %43, %45, %cst_32 {dimension_numbers = #tpu.dot_dimension_numbers<[1], [0], [0], [1], [0, 0, 1, 1], [], []>} : vector<128x4xbf16>, vector<4x128xbf16>, vector<128x128xf32> -> vector<128x128xf32>
    %47 = arith.addf %38, %46 : vector<128x128xf32>
    %c1_i32_33 = arith.constant 1 : i32
    %48 = arith.addi %1, %c1_i32_33 : i32
    %c0_34 = arith.constant 0 : index
    %49 = arith.index_cast %48 : i32 to index
    %c2_35 = arith.constant 2 : index
    %c0_36 = arith.constant 0 : index
    %50 = vector.load %arg2[%c0_34, %49, %c2_35, %c0_36] : memref<1x18x18x4xbf16, #tpu.memory_space<vmem>>, vector<1x8x16x4xbf16>
    %51 = vector.shape_cast %50 : vector<1x8x16x4xbf16> to vector<8x16x4xbf16>
    %52 = vector.shape_cast %51 : vector<8x16x4xbf16> to vector<128x4xbf16>
    %c5 = arith.constant 5 : index
    %c0_37 = arith.constant 0 : index
    %c0_38 = arith.constant 0 : index
    %53 = vector.load %arg3[%c5, %c0_37, %c0_38] : memref<9x4x128xbf16, #tpu.memory_space<vmem>>, vector<1x4x128xbf16>
    %54 = vector.shape_cast %53 : vector<1x4x128xbf16> to vector<4x128xbf16>
    %cst_39 = arith.constant dense<0.000000e+00> : vector<128x128xf32>
    %55 = tpu.matmul %52, %54, %cst_39 {dimension_numbers = #tpu.dot_dimension_numbers<[1], [0], [0], [1], [0, 0, 1, 1], [], []>} : vector<128x4xbf16>, vector<4x128xbf16>, vector<128x128xf32> -> vector<128x128xf32>
    %56 = arith.addf %47, %55 : vector<128x128xf32>
    %c2_i32 = arith.constant 2 : i32
    %57 = arith.addi %1, %c2_i32 : i32
    %c0_40 = arith.constant 0 : index
    %58 = arith.index_cast %57 : i32 to index
    %c0_41 = arith.constant 0 : index
    %c0_42 = arith.constant 0 : index
    %59 = vector.load %arg2[%c0_40, %58, %c0_41, %c0_42] : memref<1x18x18x4xbf16, #tpu.memory_space<vmem>>, vector<1x8x16x4xbf16>
    %60 = vector.shape_cast %59 : vector<1x8x16x4xbf16> to vector<8x16x4xbf16>
    %61 = vector.shape_cast %60 : vector<8x16x4xbf16> to vector<128x4xbf16>
    %c6 = arith.constant 6 : index
    %c0_43 = arith.constant 0 : index
    %c0_44 = arith.constant 0 : index
    %62 = vector.load %arg3[%c6, %c0_43, %c0_44] : memref<9x4x128xbf16, #tpu.memory_space<vmem>>, vector<1x4x128xbf16>
    %63 = vector.shape_cast %62 : vector<1x4x128xbf16> to vector<4x128xbf16>
    %cst_45 = arith.constant dense<0.000000e+00> : vector<128x128xf32>
    %64 = tpu.matmul %61, %63, %cst_45 {dimension_numbers = #tpu.dot_dimension_numbers<[1], [0], [0], [1], [0, 0, 1, 1], [], []>} : vector<128x4xbf16>, vector<4x128xbf16>, vector<128x128xf32> -> vector<128x128xf32>
    %65 = arith.addf %56, %64 : vector<128x128xf32>
    %c2_i32_46 = arith.constant 2 : i32
    %66 = arith.addi %1, %c2_i32_46 : i32
    %c0_47 = arith.constant 0 : index
    %67 = arith.index_cast %66 : i32 to index
    %c1_48 = arith.constant 1 : index
    %c0_49 = arith.constant 0 : index
    %68 = vector.load %arg2[%c0_47, %67, %c1_48, %c0_49] : memref<1x18x18x4xbf16, #tpu.memory_space<vmem>>, vector<1x8x16x4xbf16>
    %69 = vector.shape_cast %68 : vector<1x8x16x4xbf16> to vector<8x16x4xbf16>
    %70 = vector.shape_cast %69 : vector<8x16x4xbf16> to vector<128x4xbf16>
    %c7 = arith.constant 7 : index
    %c0_50 = arith.constant 0 : index
    %c0_51 = arith.constant 0 : index
    %71 = vector.load %arg3[%c7, %c0_50, %c0_51] : memref<9x4x128xbf16, #tpu.memory_space<vmem>>, vector<1x4x128xbf16>
    %72 = vector.shape_cast %71 : vector<1x4x128xbf16> to vector<4x128xbf16>
    %cst_52 = arith.constant dense<0.000000e+00> : vector<128x128xf32>
    %73 = tpu.matmul %70, %72, %cst_52 {dimension_numbers = #tpu.dot_dimension_numbers<[1], [0], [0], [1], [0, 0, 1, 1], [], []>} : vector<128x4xbf16>, vector<4x128xbf16>, vector<128x128xf32> -> vector<128x128xf32>
    %74 = arith.addf %65, %73 : vector<128x128xf32>
    %c2_i32_53 = arith.constant 2 : i32
    %75 = arith.addi %1, %c2_i32_53 : i32
    %c0_54 = arith.constant 0 : index
    %76 = arith.index_cast %75 : i32 to index
    %c2_55 = arith.constant 2 : index
    %c0_56 = arith.constant 0 : index
    %77 = vector.load %arg2[%c0_54, %76, %c2_55, %c0_56] : memref<1x18x18x4xbf16, #tpu.memory_space<vmem>>, vector<1x8x16x4xbf16>
    %78 = vector.shape_cast %77 : vector<1x8x16x4xbf16> to vector<8x16x4xbf16>
    %79 = vector.shape_cast %78 : vector<8x16x4xbf16> to vector<128x4xbf16>
    %c8 = arith.constant 8 : index
    %c0_57 = arith.constant 0 : index
    %c0_58 = arith.constant 0 : index
    %80 = vector.load %arg3[%c8, %c0_57, %c0_58] : memref<9x4x128xbf16, #tpu.memory_space<vmem>>, vector<1x4x128xbf16>
    %81 = vector.shape_cast %80 : vector<1x4x128xbf16> to vector<4x128xbf16>
    %cst_59 = arith.constant dense<0.000000e+00> : vector<128x128xf32>
    %82 = tpu.matmul %79, %81, %cst_59 {dimension_numbers = #tpu.dot_dimension_numbers<[1], [0], [0], [1], [0, 0, 1, 1], [], []>} : vector<128x4xbf16>, vector<4x128xbf16>, vector<128x128xf32> -> vector<128x128xf32>
    %83 = arith.addf %74, %82 : vector<128x128xf32>
    %c0_60 = arith.constant 0 : index
    %c0_61 = arith.constant 0 : index
    %84 = vector.load %arg4[%c0_60, %c0_61] : memref<1x128xf32, #tpu.memory_space<vmem>>, vector<1x128xf32>
    %85 = vector.broadcast %84 : vector<1x128xf32> to vector<128x128xf32>
    %86 = arith.addf %83, %85 : vector<128x128xf32>
    %cst_62 = arith.constant 0.000000e+00 : f32
    %87 = vector.broadcast %cst_62 : f32 to vector<128x128xf32>
    %88 = arith.maximumf %86, %87 : vector<128x128xf32>
    %89 = vector.shape_cast %88 : vector<128x128xf32> to vector<8x16x128xf32>
    %90 = arith.truncf %89 : vector<8x16x128xf32> to vector<8x16x128xbf16>
    %c0_63 = arith.constant 0 : index
    %c0_64 = arith.constant 0 : index
    %c0_65 = arith.constant 0 : index
    %c0_66 = arith.constant 0 : index
    %91 = vector.load %arg5[%c0_63, %c0_64, %c0_65, %c0_66] : memref<1x8x16x128xbf16, #tpu.memory_space<vmem>>, vector<1x8x16x128xbf16>
    %92 = vector.shape_cast %91 : vector<1x8x16x128xbf16> to vector<8x16x128xbf16>
    %93 = vector.shape_cast %90 : vector<8x16x128xbf16> to vector<1x8x16x128xbf16>
    tpu.vector_store %arg5[%c0_63, %c0_64, %c0_65, %c0_66], %93 {strides = array<i32>} : memref<1x8x16x128xbf16, #tpu.memory_space<vmem>>, vector<1x8x16x128xbf16>,
    return
  }
  func.func @transform_0(%arg0: i32, %arg1: i32) -> (i32, i32, i32, i32) {
    %c0_i32 = arith.constant 0 : i32
    %c0_i32_0 = arith.constant 0 : i32
    %c0_i32_1 = arith.constant 0 : i32
    %c0_i32_2 = arith.constant 0 : i32
    return %arg0, %c0_i32, %c0_i32_0, %c0_i32_1 : i32, i32, i32, i32
  }
  func.func @transform_1(%arg0: i32, %arg1: i32) -> (i32, i32, i32) {
    %c0_i32 = arith.constant 0 : i32
    %c0_i32_0 = arith.constant 0 : i32
    %c0_i32_1 = arith.constant 0 : i32
    %c0_i32_2 = arith.constant 0 : i32
    return %c0_i32, %c0_i32_0, %c0_i32_1 : i32, i32, i32
  }
  func.func @transform_2(%arg0: i32, %arg1: i32) -> (i32, i32) {
    %c0_i32 = arith.constant 0 : i32
    %c0_i32_0 = arith.constant 0 : i32
    %c0_i32_1 = arith.constant 0 : i32
    return %c0_i32, %c0_i32_0 : i32, i32
  }
  func.func @transform_3(%arg0: i32, %arg1: i32) -> (i32, i32, i32, i32) {
    %c0_i32 = arith.constant 0 : i32
    %c0_i32_0 = arith.constant 0 : i32
    %c0_i32_1 = arith.constant 0 : i32
    return %arg0, %arg1, %c0_i32, %c0_i32_0 : i32, i32, i32, i32
  }
}

</mosaic_0001>

<bundles_post_ra>
// kernel: decoder_block.1
= control target key start
LH: loop header
LB: loop body
LE: loop exit
PB: predicated region body
PF: predicated region fallthrough
CT: control target
= control target key end

     0   :  { %s3762_s12 = smov 0   ;;  %s3764_s13 = smov 0   ;;  %s4709_s0 = inlined_call_operand.vmem [shape: bf16[2,18,18,4], index: 0, kind: input, shape index: {}]   ;;  %s4710_s1 = inlined_call_operand.vmem [shape: bf16[9,4,128], index: 1, kind: input, shape index: {}]   ;;  %s4711_s2 = inlined_call_operand.vmem [shape: f32[1,128], index: 2, kind: input, shape index: {}]   ;;  %s4712_s3 = inlined_call_operand.vmem [shape: bf16[2,16,16,128], index: 3, kind: output, shape index: {}]  }
   0x1   :  { %s3766_s14 = smov 0   ;;  %s3768_s15 = smov 0  }
   0x2   :  { %s3770_s16 = smov 0  }
   0x3 LB: > { %s22_s17 = sadd.s32 1, %s3732_s14  ;;  %s25_s18 = sadd.s32 1, %s3736_s15  ;;  %s3740_s16 = sphi %s3770_s16, %s13_s16   ;;  %s3736_s15 = sphi %s3768_s15, %s4738_s15   ;;  %s3732_s14 = sphi %s3766_s14, %s4737_s14   ;;  %s3728_s13 = sphi %s3764_s13, %s4736_s13   ;;  %s3724_s12 = sphi %s3762_s12, %s4735_s12  }
   0x4   : > { %p23_p0 = scmp.ge.s32.totalorder %s22_s17, 2  ;;  %p2885_p1 = scmp.ge.s32.totalorder %s3740_s16, 1 }
   0x5   : > { %p151_p2 = scmp.lt.s32.totalorder %s3740_s16, 5 }
   0x6   : > { %s4740_s17 = smov (%p23_p0, %s22_s17), 0  ;;  %s4742_s18 = smov (!%p23_p0, %s25_s18), %s3736_s15 }
   0x7   : > { %p152_p3 = pnand %p2885_p1, %p151_p2  ;;  %p27_p4 = scmp.ge.s32.totalorder %s4742_s18, 2 }
   0x9   : > { %s4744_s18 = smov (%p27_p4, %s4742_s18), 0  ;;  %155 = sbr.rel (%p152_p3) target bundleno = 423 (0x1a7), region = 32 }
  0x10   : > { %v2894_v0 = vld [vmem:[%s4710_s1 + $0x2] sm:$0x3]  ;;  %vm472_vm0 = vcmask 1041408   ;;  %v3011_v1 = vld [vmem:[%s4710_s1 + $0x8] sm:$0x3]  ;;  %p180_p5 = scmp.lt.s32.totalorder %s3728_s13, 1 }
  0x11   : > { %3626 = vmatprep.subr.msk.bf16.mxu1 %vm472_vm0, %v2894_v0  ;;  %3630 = vmatprep.subr.msk.bf16.mxu0 %vm472_vm0, %v3011_v1  ;;  %v474_v2 = vsel %vm472_vm0, %v2894_v0, 0  ;;  %v3804_v3 = vsel %vm472_vm0, %v3011_v1, 0  ;;  %v217_v4 = vld [vmem:[%s4710_s1] sm:$0x3]  ;;  %s3189_s25 = smul.u32 96, %s3724_s12  ;;  %vm447_vm3 = vcmask 31744  }
  0x12   : > { %3335 = vmatpush3.bf16.msra.mxu1 %v474_v2  ;;  %3407 = vmatpush3.bf16.msra.mxu0 %v3804_v3  ;;  %s4746_s13 = smov (!%p180_p5, %s3728_s13), 1  ;;  %v3044_v5 = vld [vmem:[%s4710_s1 + $0xa] sm:$0x3]  ;;  %vm226_vm1 = vsmask.f32 3328  ;;  %v3846_v17 = vsel %vm472_vm0, %v217_v4, 0 }
  0x13   : > { %3627 = vmatprep.subr.msk.bf16.mxu1 %vm472_vm0, %v217_v4  ;;  %s3636_s28 = smul.u32 216, %s4746_s13  ;;  %3632 = vmatprep.subr.msk.bf16.mxu0 %vm472_vm0, %v3044_v5  ;;  %vm227_vm2 = vsmask.f32 7440  ;;  %v3852_v26 = vld [vmem:[%s4710_s1 + $0xc] sm:$0x3]  ;;  %v3869_v37 = vsel %vm472_vm0, %v3044_v5, 0 }
  0x14   : > { %vm3861_vm4 = vmor %vm226_vm1, %vm227_vm2  ;;  %v3873_v41 = vsel %vm472_vm0, %v3852_v26, 0  ;;  %vm761_vm5 = vcmask 1042432   ;;  %vm762_vm6 = vcmask 1046532   ;;  %s2889_s27 = sshll.u32 %s4746_s13, 5 }
  0x15   : > { %s184_s4 = scalar_lea.vmem %s4709_s0, %s3636_s28  ;;  %vm4016_vm7 = vmor %vm761_vm5, %vm762_vm6 }
  0x16   : > { %s3822_s5 = scalar_lea.vmem %s184_s4, %s3189_s25  ;;  %s2887_s25 = sshll.u32 %s3724_s12, 3 }
  0x17   : > { %v3825_v6 = vld [vmem:[%s3822_s5] sm:$0xf]  ;;  %v3828_v7 = vld [vmem:[%s3822_s5 + $0x4] sm:$0xf]  ;;  %v3831_v8 = vld [vmem:[%s3822_s5 + $0x8] sm:$0x1] }
  0x18   : > { %v230_v9 = vshrl.u32 %v3825_v6, 16  ;;  %v233_v10 = vshll.u32 %v3825_v6, 16  ;;  %v239_v11 = vshll.u32 %v3828_v7, 16  ;;  %v243_v12 = vshrl.u32 %v3828_v7, 16  ;;  %v2987_v13 = vld [vmem:[%s3822_s5 + $0xc] sm:$0xf] }
  0x19   : > { %v249_v14 = vshll.u32 %v3831_v8, 16  ;;  %v3840_v15 = vld [vmem:[%s3822_s5 + $0x10] sm:$0xf]  ;;  %v3843_v16 = vld [vmem:[%s3822_s5 + $0x14] sm:$0x1]  ;;  %v1213_v23 = vshrl.u32 %v2987_v13, 16 }
  0x1a   : > { %v232_v18 = vrot.slane %v230_v9, 4  ;;  %v235_v19 = vrot.slane %v233_v10, 5  ;;  %v241_v20 = vrot.slane %v239_v11, 5  ;;  %v245_v21 = vrot.slane %v243_v12, 4  ;;  %v3857_v31 = vld [vmem:[%s3822_s5 + $0xc] sm:$0xf] }
  0x1b   : > { %v251_v22 = vrot.slane %v249_v14, 5  ;;  %v1216_v24 = vshll.u32 %v2987_v13, 16  ;;  %v1222_v25 = vshll.u32 %v3840_v15, 16  ;;  %v1226_v29 = vshrl.u32 %v3840_v15, 16  ;;  %v3866_v36 = vld [vmem:[%s3822_s5 + $0x10] sm:$0xf] }
  0x1c   : > { %v236_v27 = vor.u32 %v235_v19, %v232_v18  ;;  %v246_v28 = vor.u32 %v245_v21, %v241_v20  ;;  %v1232_v30 = vshll.u32 %v3843_v16, 16  ;;  %v1215_v33 = vrot.slane %v1213_v23, 4  ;;  %v3876_v44 = vld [vmem:[%s3822_s5 + $0x14] sm:$0x1]  ;;  %v2990_v55 = vld [vmem:[%s3822_s5 + $0x18] sm:$0xf] }
  0x1d   : > { %v1218_v34 = vrot.slane %v1216_v24, 5  ;;  %v1224_v35 = vrot.slane %v1222_v25, 5  ;;  %v1228_v40 = vrot.slane %v1226_v29, 4  ;;  %v254_v45 = vshrl.u32 %v3857_v31, 16  ;;  %v3889_v60 = vld [vmem:[%s3822_s5 + $0x1c] sm:$0xf] }
  0x1e   : > { %v237_v38 = vrot.slane %v236_v27, 4  ;;  %v247_v39 = vrot.slane %v246_v28, 4  ;;  %v1234_v43 = vrot.slane %v1232_v30, 5  ;;  %v257_v46 = vshll.u32 %v3857_v31, 16  ;;  %v3897_v1 = vld [vmem:[%s3822_s5 + $0x20] sm:$0x1] }
  0x1f   : > { %v1219_v42 = vor.u32 %v1218_v34, %v1215_v33  ;;  %v1229_v49 = vor.u32 %v1228_v40, %v1224_v35  ;;  %v263_v50 = vshll.u32 %v3866_v36, 16  ;;  %v256_v53 = vrot.slane %v254_v45, 4  ;;  %v3905_v21 = vld [vmem:[%s3822_s5 + $0x18] sm:$0xf]  ;;  %v3912_v27 = vld [vmem:[%s3822_s5 + $0x1c] sm:$0xf] }
  0x20   : > { %v242_v47 = vsel %vm3861_vm4, %v237_v38, %v241_v20  ;;  %v252_v48 = vsel %vm3861_vm4, %v247_v39, %v251_v22  ;;  %v259_v54 = vrot.slane %v257_v46, 5  ;;  %v267_v58 = vshrl.u32 %v3866_v36, 16  ;;  %v3920_v38 = vld [vmem:[%s3822_s5 + $0x20] sm:$0x1]  ;;  %p188_p6 = scmp.lt.s32.totalorder %s2887_s25, 15 }
  0x21   : > { %v2895_v51 = vcombine.low %v242_v47, %v252_v48  ;;  %v1220_v52 = vrot.slane %v1219_v42, 4  ;;  %v1230_v56 = vrot.slane %v1229_v49, 4  ;;  %v265_v57 = vrot.slane %v263_v50, 5  ;;  %v2993_v47 = vld [vmem:[%s3822_s5 + $0x24] sm:$0xf] }
  0x22   : > { %v273_v59 = vshll.u32 %v3876_v44, 16  ;;  %v1604_v62 = vrot.slane %v3840_v15, 5  ;;  %v1607_v63 = vrot.slane %v3843_v16, 5  ;;  %v260_v0 = vor.u32 %v259_v54, %v256_v53  ;;  %s4748_s25 = smov (!%p188_p6, %s2887_s25), 15 }
  0x23   : > { %3336 = vmatprep.mubr.msk.bf16.mxu1 %vm447_vm3, %v2895_v51  ;;  %v1225_v61 = vsel %vm3861_vm4, %v1220_v52, %v1224_v35  ;;  %v1235_v2 = vsel %vm3861_vm4, %v1230_v56, %v1234_v43  ;;  %v269_v4 = vrot.slane %v267_v58, 4  ;;  %v1237_v9 = vshrl.u32 %v2990_v55, 16  ;;  %v3930_v52 = vld [vmem:[%s3822_s5 + $0x28] sm:$0xf]  ;;  %s2888_s26 = sshll.u32 %s4748_s25, 1 }
  0x24   : > { %v275_v5 = vrot.slane %v273_v59, 5  ;;  %v3012_v10 = vcombine.low %v1225_v61, %v1235_v2  ;;  %v261_v11 = vrot.slane %v260_v0, 4  ;;  %v1240_v12 = vshll.u32 %v2990_v55, 16  ;;  %v3942_v61 = vld [vmem:[%s3822_s5 + $0x2c] sm:$0x1]  ;;  %s192_s30 = sadd.s32 %s2889_s27, %s2888_s26 }
  0x25   : > { %v1246_v13 = vshll.u32 %v3889_v60, 16  ;;  %v270_v14 = vor.u32 %v269_v4, %v265_v57  ;;  %v1239_v18 = vrot.slane %v1237_v9, 4  ;;  %v1250_v19 = vshrl.u32 %v3889_v60, 16  ;;  %s2890_s12 = sshll.u32 %s192_s30, 2 }
  0x26   : > { %v1256_v20 = vshll.u32 %v3897_v1, 16  ;;  %3408 = vmatprep.mubr.msk.bf16.mxu0 %vm447_vm3, %v3012_v10  ;;  %v266_v22 = vsel %vm3861_vm4, %v261_v11, %v265_v57  ;;  %v1242_v23 = vrot.slane %v1240_v12, 5  ;;  %v1611_v25 = vrot.slane %v3889_v60, 5  ;;  %v3936_v57 = vld [vmem:[%s4710_s1 + $0x4] sm:$0x3] }
  0x27   : > { %v1248_v24 = vrot.slane %v1246_v13, 5  ;;  %v271_v28 = vrot.slane %v270_v14, 4  ;;  %v1252_v29 = vrot.slane %v1250_v19, 4  ;;  %v1614_v33 = vrot.slane %v3897_v1, 5  ;;  %v3949_v11 = vld [vmem:[%s3822_s5 + $0x24] sm:$0xf] }
  0x28   : > { %v1258_v30 = vrot.slane %v1256_v20, 5  ;;  %v1243_v34 = vor.u32 %v1242_v23, %v1239_v18  ;;  %v3917_v35 = vrot.slane %v1611_v25, 4  ;;  %v278_v39 = vshrl.u32 %v3905_v21, 16  ;;  %v3952_v19 = vld [vmem:[%s3822_s5 + $0x28] sm:$0xf] }
  0x29   : > { %v281_v40 = vshll.u32 %v3905_v21, 16  ;;  %v276_v42 = vsel %vm3861_vm4, %v271_v28, %v275_v5  ;;  %v1253_v43 = vor.u32 %v1252_v29, %v1248_v24  ;;  %v287_v45 = vshll.u32 %v3912_v27, 16  ;;  %v3962_v29 = vld [vmem:[%s3822_s5 + $0x2c] sm:$0x1] }
  0x2a   : > { %v291_v46 = vshrl.u32 %v3912_v27, 16  ;;  %v2896_v48 = vcombine.low %v266_v22, %v276_v42  ;;  %v1244_v49 = vrot.slane %v1243_v34, 4  ;;  %v280_v50 = vrot.slane %v278_v39, 4 }
  0x2b   : > { %v283_v51 = vrot.slane %v281_v40, 5  ;;  %v1254_v53 = vrot.slane %v1253_v43, 4  ;;  %v289_v54 = vrot.slane %v287_v45, 5  ;;  %v297_v56 = vshll.u32 %v3920_v38, 16  ;;  %v2996_v45 = vld [vmem:[%s3822_s5 + $0x30] sm:$0xf] }
  0x2c   : > { %v293_v55 = vrot.slane %v291_v46, 4  ;;  %3337 = vmatmul.mubr.msk.bf16.vlgmr.msra.gmra.mrb[0].mxu1 %vm447_vm3, %v2896_v48  ;;  %v1249_v58 = vsel %vm3861_vm4, %v1244_v49, %v1248_v24  ;;  %v1261_v0 = vshrl.u32 %v2993_v47, 16  ;;  %v1264_v2 = vshll.u32 %v2993_v47, 16 }
  0x2d   : > { %v284_v59 = vor.u32 %v283_v51, %v280_v50  ;;  %3353 = vmatpush3.bf16.msra.mxu1 %v3846_v17  ;;  %v1259_v4 = vsel %vm3861_vm4, %v1254_v53, %v1258_v30  ;;  %v299_v9 = vrot.slane %v297_v56, 5  ;;  %v1270_v10 = vshll.u32 %v3930_v52, 16  ;;  %v3972_v50 = vld [vmem:[%s3822_s5 + $0x34] sm:$0xf] }
  0x2e   : > { %v294_v5 = vor.u32 %v293_v55, %v289_v54  ;;  %v3013_v12 = vcombine.low %v1249_v58, %v1259_v4  ;;  %v1263_v14 = vrot.slane %v1261_v0, 4  ;;  %v1266_v18 = vrot.slane %v1264_v2, 5  ;;  %3628 = vmatprep.subr.msk.bf16.mxu1 %vm472_vm0, %v3936_v57  ;;  %v3982_v58 = vld [vmem:[%s3822_s5 + $0x38] sm:$0x1] }
  0x2f   : > { %v285_v13 = vrot.slane %v284_v59, 4  ;;  %v1272_v20 = vrot.slane %v1270_v10, 5  ;;  %v1274_v22 = vshrl.u32 %v3930_v52, 16  ;;  %v1280_v23 = vshll.u32 %v3942_v61, 16 }
  0x30   : > { %v295_v17 = vrot.slane %v294_v5, 4  ;;  %3409 = vmatmul.mubr.msk.bf16.vlgmr.msra.gmra.mrb[0].mxu0 %vm447_vm3, %v3013_v12  ;;  %v1267_v28 = vor.u32 %v1266_v18, %v1263_v14  ;;  %v302_v30 = vshrl.u32 %v3949_v11, 16  ;;  %v305_v34 = vshll.u32 %v3949_v11, 16  ;;  %v3987_v14 = vld [vmem:[%s3822_s5 + $0x30] sm:$0xf] }
  0x31   : > { %v290_v24 = vsel %vm3861_vm4, %v285_v13, %v289_v54  ;;  %3425 = vmatpush3.bf16.msra.mxu0 %v3869_v37  ;;  %v1276_v40 = vrot.slane %v1274_v22, 4  ;;  %v1282_v42 = vrot.slane %v1280_v23, 5  ;;  %v311_v43 = vshll.u32 %v3952_v19, 16  ;;  %v3993_v23 = vld [vmem:[%s3822_s5 + $0x34] sm:$0xf] }
  0x32   : > { %v300_v39 = vsel %vm3861_vm4, %v295_v17, %v299_v9  ;;  %v1268_v47 = vrot.slane %v1267_v28, 4  ;;  %v304_v48 = vrot.slane %v302_v30, 4  ;;  %v307_v49 = vrot.slane %v305_v34, 5  ;;  %3633 = vmatprep.subr.msk.bf16.mxu0 %vm472_vm0, %v3852_v26 }
  0x33   : > { %v2897_v46 = vcombine.low %v290_v24, %v300_v39  ;;  %v1277_v37 = vor.u32 %v1276_v40, %v1272_v20  ;;  %v313_v51 = vrot.slane %v311_v43, 5  ;;  %v315_v53 = vshrl.u32 %v3952_v19, 16  ;;  %v3998_v39 = vld [vmem:[%s3822_s5 + $0x38] sm:$0x1] }
  0x34   : > { %v321_v54 = vshll.u32 %v3962_v29, 16  ;;  %v1273_v55 = vsel %vm3861_vm4, %v1268_v47, %v1272_v20  ;;  %v308_v56 = vor.u32 %v307_v49, %v304_v48  ;;  %v1285_v59 = vshrl.u32 %v2996_v45, 16 }
  0x35   : > { %3340 = vmatprep.mubr.msk.bf16.mxu1 %vm447_vm3, %v2897_v46  ;;  %v1288_v0 = vshll.u32 %v2996_v45, 16  ;;  %v1278_v2 = vrot.slane %v1277_v37, 4  ;;  %v317_v26 = vrot.slane %v315_v53, 4  ;;  %v1294_v5 = vshll.u32 %v3972_v50, 16  ;;  %v3028_v37 = vld [vmem:[%s3822_s5 + $0xc] sm:$0xe] }
  0x36   : > { %v323_v4 = vrot.slane %v321_v54, 5  ;;  %v309_v9 = vrot.slane %v308_v56, 4  ;;  %v1287_v10 = vrot.slane %v1285_v59, 4  ;;  %v1298_v13 = vshrl.u32 %v3972_v50, 16  ;;  %v4010_v56 = vld [vmem:[%s3822_s5 + $0x3c] sm:$0xf] }
  0x37   : > { %v1290_v12 = vrot.slane %v1288_v0, 5  ;;  %v1283_v18 = vsel %vm3861_vm4, %v1278_v2, %v1282_v42  ;;  %v318_v17 = vor.u32 %v317_v26, %v313_v51  ;;  %v1296_v20 = vrot.slane %v1294_v5, 5 }
  0x38   : > { %v1304_v22 = vshll.u32 %v3982_v58, 16  ;;  %v3014_v24 = vcombine.low %v1273_v55, %v1283_v18  ;;  %v314_v28 = vsel %vm3861_vm4, %v309_v9, %v313_v51  ;;  %v1300_v34 = vrot.slane %v1298_v13, 4  ;;  %v4024_v18 = vld [vmem:[%s3822_s5 + $0x44] sm:$0x1] }
  0x39   : > { %v1291_v30 = vor.u32 %v1290_v12, %v1287_v10  ;;  %v319_v40 = vrot.slane %v318_v17, 4  ;;  %v326_v42 = vshrl.u32 %v3987_v14, 16  ;;  %v329_v45 = vshll.u32 %v3987_v14, 16  ;;  %v3029_v17 = vld [vmem:[%s3822_s5 + $0x18] sm:$0xe] }
  0x3a   : > { %v1306_v43 = vrot.slane %v1304_v22, 5  ;;  %3412 = vmatprep.mubr.msk.bf16.mxu0 %vm447_vm3, %v3014_v24  ;;  %v1301_v47 = vor.u32 %v1300_v34, %v1296_v20  ;;  %v335_v48 = vshll.u32 %v3993_v23, 16  ;;  %v339_v49 = vshrl.u32 %v3993_v23, 16 }
  0x3b   : > { %v1292_v46 = vrot.slane %v1291_v30, 4  ;;  %v324_v51 = vsel %vm3861_vm4, %v319_v40, %v323_v4  ;;  %v328_v53 = vrot.slane %v326_v42, 4  ;;  %v331_v54 = vrot.slane %v329_v45, 5  ;;  %v4021_v4 = vld [vmem:[%s3822_s5 + $0x40] sm:$0xf] }
  0x3c   : > { %v345_v55 = vshll.u32 %v3998_v39, 16  ;;  %v2898_v59 = vcombine.low %v314_v28, %v324_v51  ;;  %v1302_v2 = vrot.slane %v1301_v47, 4  ;;  %v337_v26 = vrot.slane %v335_v48, 5  ;;  %v4035_v30 = vld [vmem:[%s3822_s5 + $0x48] sm:$0xf] }
  0x3d   : > { %v1297_v0 = vsel %vm3861_vm4, %v1292_v46, %v1296_v20  ;;  %v332_v9 = vor.u32 %v331_v54, %v328_v53  ;;  %v341_v10 = vrot.slane %v339_v49, 4  ;;  %v3036_v13 = vrot.slane %v3028_v37, 9 }
  0x3e   : > { %v347_v12 = vrot.slane %v345_v55, 5  ;;  %3341 = vmatmul.mubr.msk.bf16.gmra.mrb[4].mxu1 %vm447_vm3, %v2898_v59  ;;  %v1307_v20 = vsel %vm3861_vm4, %v1302_v2, %v1306_v43  ;;  %v1606_v22 = vrot.slane %v1604_v62, 4  ;;  %v350_v24 = vshrl.u32 %v4010_v56, 16  ;;  %v4055_v55 = vld [vmem:[%s3822_s5 + $0x50] sm:$0x1] }
  0x3f   : > { %v353_v28 = vshll.u32 %v4010_v56, 16  ;;  %v3015_v34 = vcombine.low %v1297_v0, %v1307_v20  ;;  %v333_v40 = vrot.slane %v332_v9, 4  ;;  %v342_v42 = vor.u32 %v341_v10, %v337_v26 }
  0x40   : > { %v1605_v45 = vsel %vm4016_vm7, %v3036_v13, %v1604_v62  ;;  %v1608_v43 = vsel %vm4016_vm7, %v1606_v22, %v1607_v63  ;;  %v352_v46 = vrot.slane %v350_v24, 4  ;;  %v359_v48 = vshll.u32 %v4021_v4, 16  ;;  %v4051_v62 = vld [vmem:[%s3822_s5 + $0x4c] sm:$0xf] }
  0x41   : > { %v355_v47 = vrot.slane %v353_v28, 5  ;;  %3413 = vmatmul.mubr.msk.bf16.gmra.mrb[4].mxu0 %vm447_vm3, %v3015_v34  ;;  %v338_v49 = vsel %vm3861_vm4, %v333_v40, %v337_v26  ;;  %v343_v37 = vrot.slane %v342_v42, 4  ;;  %v3045_v15 = vcombine.low %v1605_v45, %v1608_v43  ;;  %v4073_v28 = vld [vmem:[%s3822_s5 + $0x54] sm:$0xf]  ;;  %v4084_v34 = vld [vmem:[%s4710_s1 + $0xe] sm:$0x3] }
  0x42   : > { %v363_v51 = vshrl.u32 %v4021_v4, 16  ;;  %v361_v53 = vrot.slane %v359_v48, 5  ;;  %v369_v63 = vshll.u32 %v4024_v18, 16  ;;  %v3037_v54 = vrot.slane %v3029_v17, 9 }
  0x43   : > { %v356_v16 = vor.u32 %v355_v47, %v352_v46  ;;  %v348_v59 = vsel %vm3861_vm4, %v343_v37, %v347_v12  ;;  %3426 = vmatprep.mubr.msk.bf16.mxu0 %vm447_vm3, %v3045_v15  ;;  %v1615_v2 = vsel %vm4016_vm7, %v3917_v35, %v1614_v33  ;;  %v374_v26 = vshrl.u32 %v4035_v30, 16  ;;  %v3030_v12 = vld [vmem:[%s3822_s5 + $0x24] sm:$0xe]  ;;  %v4089_v37 = vld [vmem:[%s3822_s5 + $0x58] sm:$0xf] }
  0x44   : > { %v365_v0 = vrot.slane %v363_v51, 4  ;;  %v2899_v9 = vcombine.low %v338_v49, %v348_v59  ;;  %v371_v13 = vrot.slane %v369_v63, 5  ;;  %v1612_v17 = vsel %vm4016_vm7, %v3037_v54, %v1611_v25  ;;  %v4098_v54 = vld [vmem:[%s3822_s5 + $0x5c] sm:$0x1] }
  0x45   : > { %v357_v10 = vrot.slane %v356_v16, 4  ;;  %v3046_v22 = vcombine.low %v1612_v17, %v1615_v2  ;;  %v376_v24 = vrot.slane %v374_v26, 4  ;;  %v377_v1 = vshll.u32 %v4035_v30, 16 }
  0x46   : > { %v366_v20 = vor.u32 %v365_v0, %v361_v53  ;;  %3344 = vmatprep.mubr.msk.bf16.mxu1 %vm447_vm3, %v2899_v9  ;;  %v383_v35 = vshll.u32 %v4051_v62, 16  ;;  %v387_v60 = vshrl.u32 %v4051_v62, 16  ;;  %v393_v25 = vshll.u32 %v4055_v55, 16 }
  0x47   : > { %v362_v33 = vsel %vm3861_vm4, %v357_v10, %v361_v53  ;;  %v379_v42 = vrot.slane %v377_v1, 5  ;;  %v3038_v45 = vrot.slane %v3030_v12, 9  ;;  %v1618_v43 = vrot.slane %v3930_v52, 5  ;;  %v3031_v10 = vld [vmem:[%s3822_s5 + $0x30] sm:$0xe] }
  0x48   : > { %v367_v40 = vrot.slane %v366_v20, 4  ;;  %v385_v46 = vrot.slane %v383_v35, 5  ;;  %v389_v47 = vrot.slane %v387_v60, 4  ;;  %v395_v48 = vrot.slane %v393_v25, 5 }
  0x49   : > { %v1621_v49 = vrot.slane %v3942_v61, 5  ;;  %3427 = vmatmul.mubr.msk.bf16.vlgmr.msra.gmra.mrb[0].mxu0 %vm447_vm3, %v3046_v22  ;;  %v380_v51 = vor.u32 %v379_v42, %v376_v24  ;;  %v1619_v16 = vsel %vm4016_vm7, %v3038_v45, %v1618_v43  ;;  %v1620_v53 = vrot.slane %v1618_v43, 4  ;;  %v4119_v42 = vld [vmem:[%s3822_s5 + $0x40] sm:$0xf]  ;;  %v4122_v45 = vld [vmem:[%s3822_s5 + $0x44] sm:$0x1] }
  0x4a   : > { %v372_v15 = vsel %vm3861_vm4, %v367_v40, %v371_v13  ;;  %3443 = vmatpush3.bf16.msra.mxu0 %v3873_v41  ;;  %v390_v52 = vor.u32 %v389_v47, %v385_v46  ;;  %v398_v61 = vshrl.u32 %v4073_v28, 16  ;;  %v401_v59 = vshll.u32 %v4073_v28, 16 }
  0x4b   : > { %v2900_v63 = vcombine.low %v362_v33, %v372_v15  ;;  %v381_v0 = vrot.slane %v380_v51, 4  ;;  %v1622_v2 = vsel %vm4016_vm7, %v1620_v53, %v1621_v49  ;;  %v407_v26 = vshll.u32 %v4089_v37, 16  ;;  %3634 = vmatprep.subr.msk.bf16.mxu0 %vm472_vm0, %v4084_v34  ;;  %v3032_v33 = vld [vmem:[%s3822_s5 + $0x3c] sm:$0xe] }
  0x4c   : > { %v411_v9 = vshrl.u32 %v4089_v37, 16  ;;  %v391_v41 = vrot.slane %v390_v52, 4  ;;  %v3047_v13 = vcombine.low %v1619_v16, %v1622_v2  ;;  %v400_v17 = vrot.slane %v398_v61, 4  ;;  %v3033_v2 = vld [vmem:[%s3822_s5 + $0x48] sm:$0xe] }
  0x4d   : > { %3345 = vmatmul.mubr.msk.bf16.gmra.mrb[8].mxu1 %vm447_vm3, %v2900_v63  ;;  %v403_v12 = vrot.slane %v401_v59, 5  ;;  %v386_v20 = vsel %vm3861_vm4, %v381_v0, %v385_v46  ;;  %v409_v22 = vrot.slane %v407_v26, 5  ;;  %v417_v1 = vshll.u32 %v4098_v54, 16  ;;  %v4137_v59 = vld [vmem:[%s3822_s5 + $0x4c] sm:$0xf] }
  0x4e   : > { %v413_v24 = vrot.slane %v411_v9, 4  ;;  %v396_v35 = vsel %vm3861_vm4, %v391_v41, %v395_v48  ;;  %3430 = vmatprep.mubr.msk.bf16.mxu0 %vm447_vm3, %v3047_v13  ;;  %v3039_v25 = vrot.slane %v3031_v10, 9  ;;  %v1625_v40 = vrot.slane %v3972_v50, 5  ;;  %v4140_v0 = vld [vmem:[%s3822_s5 + $0x50] sm:$0x1] }
  0x4f   : > { %v404_v60 = vor.u32 %v403_v12, %v400_v17  ;;  %v2901_v43 = vcombine.low %v386_v20, %v396_v35  ;;  %v419_v47 = vrot.slane %v417_v1, 5  ;;  %v1628_v49 = vrot.slane %v3982_v58, 5  ;;  %v4148_v17 = vld [vmem:[%s3822_s5 + $0x58] sm:$0xf]  ;;  %v4151_v12 = vld [vmem:[%s3822_s5 + $0x5c] sm:$0x1] }
  0x50   : > { %v414_v46 = vor.u32 %v413_v24, %v409_v22  ;;  %v1626_v48 = vsel %vm4016_vm7, %v3039_v25, %v1625_v40  ;;  %v1627_v51 = vrot.slane %v1625_v40, 4  ;;  %v3040_v16 = vrot.slane %v3032_v33, 9  ;;  %4722 = vst [vmem:[#allocation2_spill] sm:$0xff] %v4151_v12  ;;  %v4161_v35 = vld [vmem:[%s3822_s5 + $0x64] sm:$0xf] }
  0x51   : > { %v405_v15 = vrot.slane %v404_v60, 4  ;;  %3348 = vmatprep.mubr.msk.bf16.mxu1 %vm447_vm3, %v2901_v43  ;;  %v1632_v53 = vrot.slane %v4119_v42, 5  ;;  %v1635_v63 = vrot.slane %v4122_v45, 5  ;;  %v2911_v61 = vcombine.low %v3825_v6, %v3828_v7  ;;  %v3034_v6 = vld [vmem:[%s3822_s5 + $0x54] sm:$0xe]  ;;  %4723 = vst [vmem:[#allocation3_spill] sm:$0xff] %v4161_v35 }
  0x52   : > { %v415_v50 = vrot.slane %v414_v46, 4  ;;  %v1629_v58 = vsel %vm4016_vm7, %v1627_v51, %v1628_v49  ;;  %v1639_v24 = vrot.slane %v4137_v59, 5  ;;  %v1642_v1 = vrot.slane %v4140_v0, 5  ;;  %v4164_v60 = vld [vmem:[%s3822_s5 + $0x68] sm:$0x1] }
  0x53   : > { %v410_v52 = vsel %vm3861_vm4, %v405_v15, %v409_v22  ;;  %v3048_v9 = vcombine.low %v1626_v48, %v1629_v58  ;;  %v1633_v10 = vsel %vm4016_vm7, %v3040_v16, %v1632_v53  ;;  %v1634_v41 = vrot.slane %v1632_v53, 4  ;;  %4724 = vst [vmem:[#allocation4_spill] sm:$0xff] %v4164_v60 }
  0x54   : > { %v420_v26 = vsel %vm3861_vm4, %v415_v50, %v419_v47  ;;  %v3041_v22 = vrot.slane %v3033_v2, 9  ;;  %v1641_v40 = vrot.slane %v1639_v24, 4  ;;  %v3042_v43 = vrot.slane %v3034_v6, 9  ;;  %v3035_v47 = vld [vmem:[%s3822_s5 + $0x60] sm:$0xe] }
  0x55   : > { %v2902_v13 = vcombine.low %v410_v52, %v420_v26  ;;  %3431 = vmatmul.mubr.msk.bf16.gmra.mrb[4].mxu0 %vm447_vm3, %v3048_v9  ;;  %v1636_v20 = vsel %vm4016_vm7, %v1634_v41, %v1635_v63  ;;  %v1646_v46 = vrot.slane %v4148_v17, 5  ;;  %v773_v49 = vrot.slane %v3866_v36, 5  ;;  %v739_v2 = vld [vmem:[%s3822_s5 + $0x18] sm:$0xe]  ;;  %v4196_v6 = vld [vmem:[%s4710_s1 + $0x6] sm:$0x3] }
  0x56   : > { %v3049_v33 = vcombine.low %v1633_v10, %v1636_v20  ;;  %v1640_v25 = vsel %vm4016_vm7, %v3041_v22, %v1639_v24  ;;  %v1649_v15 = vrot.slane %v4151_v12, 5  ;;  %v1643_v48 = vsel %vm4016_vm7, %v1641_v40, %v1642_v1  ;;  %v741_v1 = vld [vmem:[%s3822_s5 + $0x30] sm:$0xe] }
  0x57   : > { %3349 = vmatmul.mubr.msk.bf16.gmra.mrb[12].mxu1 %vm447_vm3, %v2902_v13  ;;  %v1647_v51 = vsel %vm4016_vm7, %v3042_v43, %v1646_v46  ;;  %v1648_v16 = vrot.slane %v1646_v46, 4  ;;  %v1653_v50 = vrot.slane %v4161_v35, 5  ;;  %v2912_v53 = vcombine.low %v3857_v31, %v3866_v36  ;;  %v740_v36 = vld [vmem:[%s3822_s5 + $0x24] sm:$0xe]  ;;  %v4470_v12 = vld [vmem:[%s3822_s5 + $0x70] sm:$0xf] }
  0x58   : > { %3354 = vmatprep.mubr.msk.bf16.mxu1 %vm447_vm3, %v2911_v61  ;;  %3434 = vmatprep.mubr.msk.bf16.mxu0 %vm447_vm3, %v3049_v33  ;;  %v3050_v63 = vcombine.low %v1640_v25, %v1643_v48  ;;  %v3043_v52 = vrot.slane %v3035_v47, 9  ;;  %v1656_v58 = vrot.slane %v4164_v60, 5  ;;  %v738_v61 = vld [vmem:[%s3822_s5 + $0xc] sm:$0xe]  ;;  %v776_v26 = vrot.slane %v3876_v44, 5 }
  0x59   : > { %v2913_v9 = vcombine.low %v3905_v21, %v3912_v27  ;;  %v1650_v10 = vsel %vm4016_vm7, %v1648_v16, %v1649_v15  ;;  %v1655_v41 = vrot.slane %v1653_v50, 4  ;;  %v871_v13 = vsel %vm472_vm0, %v3936_v57, 0  ;;  %v3682_v16 = vld [vmem:[%s3822_s5 + $0x18] sm:$0xff]   ;;  %v4442_v60 = vld [vmem:[%s3822_s5 + $0x64] sm:$0xf] }
  0x5a   : > { %v3051_v31 = vcombine.low %v1647_v51, %v1650_v10  ;;  %v2928_v44 = vrot.slane %v738_v61, 9  ;;  %v775_v20 = vrot.slane %v773_v49, 4  ;;  %v2929_v21 = vrot.slane %v739_v2, 9  ;;  %4725 = vst [vmem:[#allocation5_spill] sm:$0xff] %v4442_v60 }
  0x5b   : > { %v1654_v22 = vsel %vm4016_vm7, %v3043_v52, %v1653_v50  ;;  %v1657_v57 = vsel %vm4016_vm7, %v1655_v41, %v1656_v58  ;;  %v780_v24 = vrot.slane %v3912_v27, 5  ;;  %v783_v40 = vrot.slane %v3920_v38, 5 }
  0x5c   : > { %v4209_v33 = vsel %vm4016_vm7, %v2928_v44, %v773_v49  ;;  %v4213_v25 = vsel %vm4016_vm7, %v775_v20, %v776_v26  ;;  %v2930_v43 = vrot.slane %v740_v36, 9  ;;  %v3052_v49 = vcombine.low %v1654_v22, %v1657_v57  ;;  %v3096_v26 = vld [vmem:[%s3822_s5 + $0x18] sm:$0xf]  ;;  %v3684_v57 = vld [vmem:[%s3822_s5 + $0x24] sm:$0xff]  }
  0x5d   : > { %3435 = vmatmul.mubr.msk.bf16.gmra.mrb[8].mxu0 %vm447_vm3, %v3050_v63  ;;  %v2937_v27 = vcombine.low %v4209_v33, %v4213_v25  ;;  %v4222_v46 = vsel %vm4016_vm7, %v2929_v21, %v780_v24  ;;  %v782_v47 = vrot.slane %v780_v24, 4  ;;  %v787_v15 = vrot.slane %v3952_v19, 5 }
  0x5e   : > { %3438 = vmatprep.mubr.msk.bf16.mxu0 %vm447_vm3, %v3051_v31  ;;  %v790_v48 = vrot.slane %v3962_v29, 5  ;;  %v2931_v38 = vrot.slane %v741_v1, 9  ;;  %v2914_v51 = vcombine.low %v3949_v11, %v3952_v19  ;;  %v797_v63 = vrot.slane %v3998_v39, 5  ;;  %v742_v19 = vld [vmem:[%s3822_s5 + $0x3c] sm:$0xe] }
  0x5f   : > { %3355 = vmatmul.mubr.msk.bf16.vlgmr.msra.gmra.mrb[0].mxu1 %vm447_vm3, %v2912_v53  ;;  %v4231_v50 = vsel %vm4016_vm7, %v782_v47, %v783_v40  ;;  %v794_v53 = vrot.slane %v3993_v23, 5  ;;  %v2915_v52 = vcombine.low %v3987_v14, %v3993_v23  ;;  %v4241_v58 = vsel %vm4016_vm7, %v2930_v43, %v787_v15  ;;  %v737_v14 = vld [vmem:[%s3822_s5] sm:$0xe]  ;;  %v4269_v31 = vld [vmem:[%s3822_s5 + $0x1c] sm:$0xf] }
  0x60   : > { %3371 = vmatpush3.bf16.msra.mxu1 %v871_v13  ;;  %3358 = vmatprep.mubr.msk.bf16.mxu1 %vm447_vm3, %v2913_v9  ;;  %v2938_v29 = vcombine.low %v4222_v46, %v4231_v50  ;;  %v789_v11 = vrot.slane %v787_v15, 4  ;;  %v766_v61 = vrot.slane %v3828_v7, 5  ;;  %v2932_v10 = vrot.slane %v742_v19, 9  ;;  %v743_v1 = vld [vmem:[%s3822_s5 + $0x48] sm:$0xe] }
  0x61   : > { %3629 = vmatprep.subr.msk.bf16.mxu1 %vm472_vm0, %v4196_v6  ;;  %v4247_v2 = vsel %vm4016_vm7, %v2931_v38, %v794_v53  ;;  %v796_v39 = vrot.slane %v794_v53, 4  ;;  %v769_v41 = vrot.slane %v3831_v8, 5  ;;  %v2927_v36 = vrot.slane %v737_v14, 9  ;;  %v4295_v38 = vld [vmem:[%s4710_s1 + $0x10] sm:$0x3] }
  0x62   : > { %v4253_v23 = vsel %vm4016_vm7, %v789_v11, %v790_v48  ;;  %v768_v44 = vrot.slane %v766_v61, 4  ;;  %v801_v20 = vrot.slane %v4021_v4, 5  ;;  %v804_v21 = vrot.slane %v4024_v18, 5  ;;  %v4316_v14 = vld [vmem:[%s3822_s5 + $0x28] sm:$0xf] }
  0x63   : > { %v4262_v9 = vsel %vm4016_vm7, %v796_v39, %v797_v63  ;;  %v2916_v22 = vcombine.low %v4010_v56, %v4021_v4  ;;  %v2051_v24 = vshrl.u32 %v3096_v26, 16  ;;  %v2054_v8 = vshll.u32 %v3096_v26, 16  ;;  %v3686_v4 = vld [vmem:[%s3822_s5 + $0x30] sm:$0xff]   ;;  %v4418_v46 = vld [vmem:[%s3822_s5 + $0x44] sm:$0x1] }
  0x64   : > { %v2060_v40 = vshll.u32 %v4269_v31, 16  ;;  %v2064_v43 = vshrl.u32 %v4269_v31, 16  ;;  %v4281_v47 = vsel %vm4016_vm7, %v2932_v10, %v801_v20  ;;  %v2293_v18 = vsel %vm472_vm0, %v4084_v34, 0  ;;  %v3114_v7 = vld [vmem:[%s3822_s5 + $0x60] sm:$0xf] }
  0x65   : > { %3439 = vmatmul.mubr.msk.bf16.gmra.mrb[12].mxu0 %vm447_vm3, %v3052_v49  ;;  %v803_v49 = vrot.slane %v801_v20, 4  ;;  %v2917_v56 = vcombine.low %v4035_v30, %v4051_v62  ;;  %v767_v15 = vsel %vm4016_vm7, %v2927_v36, %v766_v61  ;;  %v770_v48 = vsel %vm4016_vm7, %v768_v44, %v769_v41  ;;  %v4303_v30 = vld [vmem:[%s3822_s5 + $0x20] sm:$0x1]  ;;  %v3099_v61 = vld [vmem:[%s3822_s5 + $0x24] sm:$0xf] }
  0x66   : > { %3444 = vmatprep.mubr.msk.bf16.mxu0 %vm447_vm3, %v3682_v16  ;;  %v2933_v34 = vrot.slane %v743_v1, 9  ;;  %v2053_v16 = vrot.slane %v2051_v24, 4  ;;  %v2056_v53 = vrot.slane %v2054_v8, 5  ;;  %v4309_v11 = vrot.slane %v2060_v40, 5  ;;  %v744_v44 = vld [vmem:[%s3822_s5 + $0x54] sm:$0xe] }
  0x67   : > { %3359 = vmatmul.mubr.msk.bf16.gmra.mrb[4].mxu1 %vm447_vm3, %v2914_v51  ;;  %v4299_v51 = vsel %vm4016_vm7, %v803_v49, %v804_v21  ;;  %v2066_v19 = vrot.slane %v2064_v43, 4  ;;  %v811_v39 = vrot.slane %v4055_v55, 5  ;;  %v2918_v10 = vcombine.low %v4073_v28, %v4089_v37  ;;  %v3102_v55 = vld [vmem:[%s3822_s5 + $0x30] sm:$0xf]  ;;  %v3688_v20 = vld [vmem:[%s3822_s5 + $0x3c] sm:$0xff]   ;;  %v3689_v1 = vld [vmem:[%s3822_s5 + $0x48] sm:$0xff]  }
  0x68   : > { %3362 = vmatprep.mubr.msk.bf16.mxu1 %vm447_vm3, %v2915_v52  ;;  %v808_v52 = vrot.slane %v4051_v62, 5  ;;  %v2936_v41 = vcombine.low %v767_v15, %v770_v48  ;;  %v2070_v36 = vshll.u32 %v4303_v30, 16  ;;  %v2057_v21 = vor.u32 %v2056_v53, %v2053_v16  ;;  %v4335_v8 = vld [vmem:[%s3822_s5 + $0x34] sm:$0xf] }
  0x69   : > { %v2067_v28 = vor.u32 %v2066_v19, %v4309_v11  ;;  %v2084_v40 = vshll.u32 %v4316_v14, 16  ;;  %v2088_v43 = vshrl.u32 %v4316_v14, 16  ;;  %v815_v15 = vrot.slane %v4089_v37, 5 }
  0x6a   : > { %v4320_v62 = vsel %vm4016_vm7, %v2933_v34, %v808_v52  ;;  %v810_v26 = vrot.slane %v808_v52, 4  ;;  %v2108_v48 = vshll.u32 %v4335_v8, 16  ;;  %v2112_v34 = vshrl.u32 %v4335_v8, 16 }
  0x6b   : > { %v818_v16 = vrot.slane %v4098_v54, 5  ;;  %v2058_v53 = vrot.slane %v2057_v21, 4  ;;  %v2072_v52 = vrot.slane %v2070_v36, 5  ;;  %v2068_v37 = vrot.slane %v2067_v28, 4  ;;  %v4358_v36 = vld [vmem:[%s3822_s5 + $0x2c] sm:$0x1] }
  0x6c   : > { %v4332_v24 = vsel %vm4016_vm7, %v810_v26, %v811_v39  ;;  %v4354_v26 = vrot.slane %v2084_v40, 5  ;;  %v4365_v21 = vld [vmem:[%s3822_s5 + $0x38] sm:$0x1]  ;;  %v1073_v28 = vsel %vm472_vm0, %v4196_v6, 0 }
  0x6d   : > { %3445 = vmatmul.mubr.msk.bf16.vlgmr.msra.gmra.mrb[0].mxu0 %vm447_vm3, %v3684_v57  ;;  %v2078_v57 = vshll.u32 %v3099_v61, 16  ;;  %v3690_v40 = vld [vmem:[%s3822_s5 + $0x54] sm:$0xff]  }
  0x6e   : > { %3461 = vmatpush3.bf16.msra.mxu0 %v2293_v18  ;;  %3448 = vmatprep.mubr.msk.bf16.mxu0 %vm447_vm3, %v3686_v4  ;;  %v2099_v18 = vshrl.u32 %v3102_v55, 16  ;;  %v2934_v4 = vrot.slane %v744_v44, 9 }
  0x6f   : > { %3363 = vmatmul.mubr.msk.bf16.gmra.mrb[8].mxu1 %vm447_vm3, %v2916_v22  ;;  %3635 = vmatprep.subr.msk.bf16.mxu0 %vm472_vm0, %v4295_v38  ;;  %v2075_v22 = vshrl.u32 %v3099_v61, 16  ;;  %v817_v61 = vrot.slane %v815_v15, 4  ;;  %v2080_v54 = vrot.slane %v2078_v57, 5  ;;  %v2114_v57 = vrot.slane %v2112_v34, 4  ;;  %v3108_v34 = vld [vmem:[%s3822_s5 + $0x48] sm:$0xf] }
  0x70   : > { %3366 = vmatprep.mubr.msk.bf16.mxu1 %vm447_vm3, %v2917_v56  ;;  %v2102_v56 = vshll.u32 %v3102_v55, 16  ;;  %v4350_v19 = vsel %vm4016_vm7, %v2934_v4, %v815_v15  ;;  %v2090_v55 = vrot.slane %v2088_v43, 4  ;;  %v2101_v44 = vrot.slane %v2099_v18, 4  ;;  %v4376_v43 = vld [vmem:[%s3822_s5 + $0x40] sm:$0xf] }
  0x71   : > { %v2077_v39 = vrot.slane %v2075_v22, 4  ;;  %v4367_v22 = vrot.slane %v2108_v48, 5  ;;  %v3691_v18 = vld [vmem:[%s3822_s5 + $0x60] sm:$0xff]   ;;  %v2073_v4 = vsel %vm3861_vm4, %v2068_v37, %v2072_v52  ;;  %v2094_v48 = vshll.u32 %v4358_v36, 16 }
  0x72   : > { %v2147_v52 = vshrl.u32 %v3108_v34, 16  ;;  %v2150_v37 = vshll.u32 %v3108_v34, 16 }
  0x73   : > { %v2081_v15 = vor.u32 %v2080_v54, %v2077_v39  ;;  %v2115_v63 = vor.u32 %v2114_v57, %v4367_v22  ;;  %v3111_v57 = vld [vmem:[%s3822_s5 + $0x54] sm:$0xf] }
  0x74   : > { %v2149_v50 = vrot.slane %v2147_v52, 4  ;;  %v2174_v34 = vshll.u32 %v3111_v57, 16 }
  0x75   : > { %3449 = vmatmul.mubr.msk.bf16.gmra.mrb[4].mxu0 %vm447_vm3, %v3688_v20  ;;  %v2104_v20 = vrot.slane %v2102_v56, 5  ;;  %v2063_v56 = vsel %vm3861_vm4, %v2058_v53, %v4309_v11  ;;  %v2132_v11 = vshll.u32 %v4376_v43, 16  ;;  %v2136_v53 = vshrl.u32 %v4376_v43, 16 }
  0x76   : > { %3452 = vmatprep.mubr.msk.bf16.mxu0 %vm447_vm3, %v3689_v1  ;;  %v2118_v1 = vshll.u32 %v4365_v21, 16  ;;  %v3121_v54 = vcombine.low %v2063_v56, %v2073_v4  ;;  %v2116_v56 = vrot.slane %v2115_v63, 4  ;;  %v4423_v63 = vld [vmem:[%s3822_s5 + $0x50] sm:$0x1] }
  0x77   : > { %3367 = vmatmul.mubr.msk.bf16.gmra.mrb[12].mxu1 %vm447_vm3, %v2918_v10  ;;  %v4362_v10 = vsel %vm4016_vm7, %v817_v61, %v818_v16  ;;  %v4387_v16 = vld [vmem:[%s3822_s5 + $0x4c] sm:$0xf]  ;;  %v2091_v61 = vor.u32 %v2090_v55, %v4354_v26  ;;  %v2105_v6 = vor.u32 %v2104_v20, %v2101_v44  ;;  %v2082_v55 = vrot.slane %v2081_v15, 4 }
  0x78   : > { %3372 = vmatprep.mubr.msk.bf16.mxu1 %vm447_vm3, %v2936_v41  ;;  %v3105_v41 = vld [vmem:[%s3822_s5 + $0x3c] sm:$0xf]  ;;  %v2156_v39 = vshll.u32 %v4387_v16, 16  ;;  %v2096_v44 = vrot.slane %v2094_v48, 5  ;;  %v2160_v20 = vshrl.u32 %v4387_v16, 16  ;;  %v2120_v33 = vrot.slane %v2118_v1, 5 }
  0x79   : > { %v2123_v49 = vshrl.u32 %v3105_v41, 16  ;;  %v2126_v13 = vshll.u32 %v3105_v41, 16  ;;  %v2092_v41 = vrot.slane %v2091_v61, 4  ;;  %v4411_v15 = vrot.slane %v2132_v11, 5 }
  0x7a   : > { %v2138_v48 = vrot.slane %v2136_v53, 4  ;;  %v2171_v1 = vshrl.u32 %v3111_v57, 16  ;;  %v1342_v11 = vshll.u32 %v4137_v59, 16  ;;  %v2087_v53 = vsel %vm3861_vm4, %v2082_v55, %v4354_v26 }
  0x7b   : > { %v2125_v25 = vrot.slane %v2123_v49, 4  ;;  %v2128_v4 = vrot.slane %v2126_v13, 5  ;;  %v4420_v49 = vrot.slane %v2156_v39, 5  ;;  %v2162_v13 = vrot.slane %v2160_v20, 4 }
  0x7c   : > { %v2097_v52 = vsel %vm3861_vm4, %v2092_v41, %v2096_v44  ;;  %v2139_v57 = vor.u32 %v2138_v48, %v4411_v15  ;;  %v2121_v26 = vsel %vm3861_vm4, %v2116_v56, %v2120_v33  ;;  %v2173_v44 = vrot.slane %v2171_v1, 4  ;;  %v4461_v56 = vld [vmem:[%s3822_s5 + $0x5c] sm:$0x1] }
  0x7d   : > { %3453 = vmatmul.mubr.msk.bf16.gmra.mrb[8].mxu0 %vm447_vm3, %v3690_v40  ;;  %v2106_v40 = vrot.slane %v2105_v6, 4  ;;  %v2129_v20 = vor.u32 %v2128_v4, %v2125_v25  ;;  %v2163_v41 = vor.u32 %v2162_v13, %v4420_v49  ;;  %v4727_v33 = vcombine.low %v4247_v2, %v4262_v9 }
  0x7e   : > { %3456 = vmatprep.mubr.msk.bf16.mxu0 %vm447_vm3, %v3691_v18  ;;  %v3692_v18 = vld [vmem:[%s3822_s5 + $0x6c] sm:$0xff]   ;;  %v2195_v4 = vshrl.u32 %v3114_v7, 16  ;;  %v1346_v48 = vshrl.u32 %v4137_v59, 16  ;;  %v3122_v13 = vcombine.low %v2087_v53, %v2097_v52 }
  0x7f   : > { %3373 = vmatmul.mubr.msk.bf16.vlgmr.msra.gmra.mrb[0].mxu1 %vm447_vm3, %v2937_v27  ;;  %v4408_v27 = vld [vmem:[%s3822_s5 + $0x58] sm:$0xf]  ;;  %v2111_v39 = vsel %vm3861_vm4, %v2106_v40, %v4367_v22  ;;  %v4726_v22 = vcombine.low %v4241_v58, %v4253_v23  ;;  %v2176_v40 = vrot.slane %v2174_v34, 5  ;;  %v2198_v58 = vshll.u32 %v3114_v7, 16 }
  0x80   : > { %3389 = vmatpush3.bf16.msra.mxu1 %v1073_v28  ;;  %3376 = vmatprep.mubr.msk.bf16.mxu1 %vm447_vm3, %v2938_v29  ;;  %v3701_v28 = vld [vmem:[%s4710_s1 + $0x8] sm:$0x3]  ;;  %v2152_v29 = vrot.slane %v2150_v37, 5  ;;  %v2180_v61 = vshll.u32 %v4408_v27, 16  ;;  %v2184_v6 = vshrl.u32 %v4408_v27, 16  ;;  %v2547_v37 = vsel %vm472_vm0, %v4295_v38, 0 }
  0x81   : > { %3631 = vmatprep.subr.msk.bf16.mxu1 %vm472_vm0, %v3701_v28  ;;  %v2142_v28 = vshll.u32 %v4418_v46, 16  ;;  %v2166_v38 = vshll.u32 %v4423_v63, 16  ;;  %v2204_v23 = vshll.u32 %v4442_v60, 16  ;;  %v3123_v34 = vcombine.low %v2111_v39, %v2121_v26 }
  0x82   : > { %v2153_v55 = vor.u32 %v2152_v29, %v2149_v50  ;;  %v4454_v25 = vrot.slane %v2180_v61, 5  ;;  %v2130_v50 = vrot.slane %v2129_v20, 4  ;;  %v2140_v29 = vrot.slane %v2139_v57, 4 }
  0x83   : > { %v2144_v1 = vrot.slane %v2142_v28, 5  ;;  %v2168_v9 = vrot.slane %v2166_v38, 5  ;;  %v2164_v61 = vrot.slane %v2163_v41, 4  ;;  %v2190_v7 = vshll.u32 %v4461_v56, 16  ;;  %v4482_v28 = vld [vmem:[%s3822_s5 + $0x68] sm:$0x1] }
  0x84   : > { %v2154_v2 = vrot.slane %v2153_v55, 4  ;;  %v2197_v35 = vrot.slane %v2195_v4, 4  ;;  %v4472_v59 = vrot.slane %v2204_v23, 5  ;;  %v4474_v57 = vrot.slane %v1342_v11, 5 }
  0x85   : > { %3457 = vmatmul.mubr.msk.bf16.gmra.mrb[12].mxu0 %vm447_vm3, %v3692_v18  ;;  %v2186_v18 = vrot.slane %v2184_v6, 4  ;;  %v2177_v6 = vor.u32 %v2176_v40, %v2173_v44  ;;  %v1348_v53 = vrot.slane %v1346_v48, 4  ;;  %v2135_v52 = vsel %vm3861_vm4, %v2130_v50, %v4411_v15 }
  0x86   : > { %3462 = vmatprep.mubr.msk.bf16.mxu0 %vm447_vm3, %v3121_v54  ;;  %v2208_v54 = vshrl.u32 %v4442_v60, 16  ;;  %v2200_v60 = vrot.slane %v2198_v58, 5  ;;  %v2145_v39 = vsel %vm3861_vm4, %v2140_v29, %v2144_v1  ;;  %v2228_v38 = vshll.u32 %v4470_v12, 16  ;;  %v3693_v1 = vld [vmem:[%s3822_s5 + $0xc] sm:$0xff]  }
  0x87   : > { %3377 = vmatmul.mubr.msk.bf16.gmra.mrb[4].mxu1 %vm447_vm3, %v4726_v22  ;;  %v2187_v22 = vor.u32 %v2186_v18, %v4454_v25  ;;  %v2232_v44 = vshrl.u32 %v4470_v12, 16  ;;  %v4728_v11 = vcombine.low %v4281_v47, %v4299_v51  ;;  %v2159_v15 = vsel %vm3861_vm4, %v2154_v2, %v4420_v49 }
  0x88   : > { %3380 = vmatprep.mubr.msk.bf16.mxu1 %vm447_vm3, %v4727_v33  ;;  %v3117_v33 = vld [vmem:[%s3822_s5 + $0x6c] sm:$0xf]  ;;  %v2210_v20 = vrot.slane %v2208_v54, 4  ;;  %v2169_v41 = vsel %vm3861_vm4, %v2164_v61, %v2168_v9  ;;  %v2178_v40 = vrot.slane %v2177_v6, 4  ;;  %v2192_v18 = vrot.slane %v2190_v7, 5 }
  0x89   : > { %v2219_v26 = vshrl.u32 %v3117_v33, 16  ;;  %v2222_v55 = vshll.u32 %v3117_v33, 16  ;;  %v4729_v4 = vcombine.low %v4320_v62, %v4332_v24  ;;  %v2188_v47 = vrot.slane %v2187_v22, 4  ;;  %v3002_v22 = vld [vmem:[%s3822_s5 + $0x48] sm:$0xf] }
  0x8a   : > { %v2201_v51 = vor.u32 %v2200_v60, %v2197_v35  ;;  %v2214_v49 = vshll.u32 %v4482_v28, 16  ;;  %v1349_v58 = vor.u32 %v1348_v53, %v4474_v57  ;;  %v1352_v23 = vshll.u32 %v4140_v0, 16  ;;  %v4511_v60 = vld [vmem:[%s3822_s5 + $0x74] sm:$0x1] }
  0x8b   : > { %v3124_v54 = vcombine.low %v2135_v52, %v2145_v39  ;;  %v2221_v48 = vrot.slane %v2219_v26, 4  ;;  %v2224_v62 = vrot.slane %v2222_v55, 5  ;;  %v4505_v24 = vrot.slane %v2228_v38, 5 }
  0x8c   : > { %v2234_v50 = vrot.slane %v2232_v44, 4  ;;  %v3125_v29 = vcombine.low %v2159_v15, %v2169_v41  ;;  %v2183_v35 = vsel %vm3861_vm4, %v2178_v40, %v4454_v25  ;;  %v2202_v0 = vrot.slane %v2201_v51, 4  ;;  %v3695_v51 = vld [vmem:[%s3822_s5 + $0x24] sm:$0xff]  }
  0x8d   : > { %3463 = vmatmul.mubr.msk.bf16.vlgmr.msra.gmra.mrb[0].mxu0 %vm447_vm3, %v3122_v13  ;;  %v2193_v13 = vsel %vm3861_vm4, %v2188_v47, %v2192_v18  ;;  %v2216_v2 = vrot.slane %v2214_v49, 5  ;;  %v1350_v9 = vrot.slane %v1349_v58, 4  ;;  %v1354_v61 = vrot.slane %v1352_v23, 5 }
  0x8e   : > { %3479 = vmatpush3.bf16.msra.mxu0 %v2547_v37  ;;  %3466 = vmatprep.mubr.msk.bf16.mxu0 %vm447_vm3, %v3123_v34  ;;  %v2211_v37 = vor.u32 %v2210_v20, %v4472_v59  ;;  %v2442_v6 = vrot.slane %v4269_v31, 5  ;;  %v2225_v7 = vor.u32 %v2224_v62, %v2221_v48  ;;  %v2235_v33 = vor.u32 %v2234_v50, %v4505_v24  ;;  %v3137_v20 = vld [vmem:[%s3822_s5 + $0x18] sm:$0xe]  ;;  %v3139_v62 = vld [vmem:[%s3822_s5 + $0x30] sm:$0xe] }
  0x8f   : > { %3381 = vmatmul.mubr.msk.bf16.gmra.mrb[8].mxu1 %vm447_vm3, %v4728_v11  ;;  %v2238_v25 = vshll.u32 %v4511_v60, 16  ;;  %v4730_v53 = vcombine.low %v4350_v19, %v4362_v10  ;;  %v3126_v52 = vcombine.low %v2183_v35, %v2193_v13  ;;  %v2207_v31 = vsel %vm3861_vm4, %v2202_v0, %v4472_v59  ;;  %v3694_v59 = vld [vmem:[%s3822_s5 + $0x18] sm:$0xff]  }
  0x90   : > { %3384 = vmatprep.mubr.msk.bf16.mxu1 %vm447_vm3, %v4729_v4  ;;  %v2212_v34 = vrot.slane %v2211_v37, 4  ;;  %v1333_v26 = vshrl.u32 %v3002_v22, 16  ;;  %v1336_v55 = vshll.u32 %v3002_v22, 16  ;;  %v3145_v19 = vrot.slane %v3137_v20, 9  ;;  %v2999_v4 = vld [vmem:[%s3822_s5 + $0x3c] sm:$0xf] }
  0x91   : > { %v2444_v10 = vrot.slane %v2442_v6, 4  ;;  %v2445_v38 = vrot.slane %v4303_v30, 5  ;;  %v1355_v44 = vsel %vm3861_vm4, %v1350_v9, %v1354_v61  ;;  %v2226_v11 = vrot.slane %v2225_v7, 4  ;;  %v3138_v30 = vld [vmem:[%s3822_s5 + $0x24] sm:$0xe]  ;;  %v3696_v22 = vld [vmem:[%s3822_s5 + $0x30] sm:$0xff]  }
  0x92   : > { %v2217_v39 = vsel %vm3861_vm4, %v2212_v34, %v2216_v2  ;;  %v2236_v15 = vrot.slane %v2235_v33, 4  ;;  %v2240_v41 = vrot.slane %v2238_v25, 5  ;;  %v1335_v40 = vrot.slane %v1333_v26, 4  ;;  %v3697_v20 = vld [vmem:[%s3822_s5 + $0x3c] sm:$0xff]   ;;  %v3005_v26 = vld [vmem:[%s3822_s5 + $0x54] sm:$0xf] }
  0x93   : > { %v3127_v18 = vcombine.low %v2207_v31, %v2217_v39  ;;  %v1338_v47 = vrot.slane %v1336_v55, 5  ;;  %v2443_v37 = vsel %vm4016_vm7, %v3145_v19, %v2442_v6  ;;  %v2446_v49 = vsel %vm4016_vm7, %v2444_v10, %v2445_v38  ;;  %v3141_v38 = vld [vmem:[%s3822_s5 + $0x48] sm:$0xe] }
  0x94   : > { %v2449_v58 = vrot.slane %v4316_v14, 5  ;;  %v2241_v48 = vsel %vm3861_vm4, %v2236_v15, %v2240_v41  ;;  %v2456_v50 = vrot.slane %v4335_v8, 5  ;;  %v1312_v35 = vshll.u32 %v2999_v4, 16 }
  0x95   : > { %3467 = vmatmul.mubr.msk.bf16.gmra.mrb[4].mxu0 %vm447_vm3, %v3124_v54  ;;  %v1339_v23 = vor.u32 %v1338_v47, %v1335_v40  ;;  %v2231_v54 = vsel %vm3861_vm4, %v2226_v11, %v4505_v24  ;;  %v1318_v14 = vshll.u32 %v4119_v42, 16  ;;  %v3146_v24 = vrot.slane %v3138_v30, 9 }
  0x96   : > { %3470 = vmatprep.mubr.msk.bf16.mxu0 %vm447_vm3, %v3125_v29  ;;  %v1309_v29 = vshrl.u32 %v2999_v4, 16  ;;  %v2452_v8 = vrot.slane %v4358_v36, 5  ;;  %v3154_v0 = vcombine.low %v2443_v37, %v2446_v49  ;;  %v2451_v34 = vrot.slane %v2449_v58, 4  ;;  %v3698_v37 = vld [vmem:[%s3822_s5 + $0x48] sm:$0xff]  }
  0x97   : > { %3385 = vmatmul.mubr.msk.bf16.gmra.mrb[12].mxu1 %vm447_vm3, %v4730_v53  ;;  %v1340_v13 = vrot.slane %v1339_v23, 4  ;;  %v3147_v2 = vrot.slane %v3139_v62, 9  ;;  %v3128_v61 = vcombine.low %v2231_v54, %v2241_v48  ;;  %v2458_v6 = vrot.slane %v2456_v50, 4  ;;  %v3699_v23 = vld [vmem:[%s3822_s5 + $0x54] sm:$0xff]  }
  0x98   : > { %3390 = vmatprep.mubr.msk.bf16.mxu1 %vm447_vm3, %v3693_v1  ;;  %v1322_v1 = vshrl.u32 %v4119_v42, 16  ;;  %v2459_v42 = vrot.slane %v4365_v21, 5  ;;  %v1311_v7 = vrot.slane %v1309_v29, 4  ;;  %v1314_v33 = vrot.slane %v1312_v35, 5 }
  0x99   : > { %v1345_v9 = vsel %vm3861_vm4, %v1340_v13, %v4474_v57  ;;  %v4567_v25 = vrot.slane %v1318_v14, 5  ;;  %v2450_v53 = vsel %vm4016_vm7, %v3146_v24, %v2449_v58  ;;  %v2453_v57 = vsel %vm4016_vm7, %v2451_v34, %v2452_v8  ;;  %v3142_v24 = vld [vmem:[%s3822_s5 + $0x54] sm:$0xe]  ;;  %v4731_v8 = vld [vmem:[#allocation5_spill] sm:$0xff] }
  0x9a   : > { %v1324_v36 = vrot.slane %v1322_v1, 4  ;;  %v2457_v21 = vsel %vm4016_vm7, %v3147_v2, %v2456_v50  ;;  %v2463_v31 = vrot.slane %v4376_v43, 5  ;;  %v1328_v39 = vshll.u32 %v4122_v45, 16  ;;  %v3008_v50 = vld [vmem:[%s3822_s5 + $0x60] sm:$0xf] }
  0x9b   : > { %v2460_v55 = vsel %vm4016_vm7, %v2458_v6, %v2459_v42  ;;  %v1315_v19 = vor.u32 %v1314_v33, %v1311_v7  ;;  %v3155_v43 = vcombine.low %v2450_v53, %v2453_v57  ;;  %v2466_v11 = vrot.slane %v4418_v46, 5  ;;  %v4733_v33 = vld [vmem:[#allocation2_spill] sm:$0xff] }
  0x9c   : > { %v1325_v10 = vor.u32 %v1324_v36, %v4567_v25  ;;  %v1357_v15 = vshrl.u32 %v3005_v26, 16  ;;  %v1360_v41 = vshll.u32 %v3005_v26, 16  ;;  %v1366_v40 = vshll.u32 %v4148_v17, 16 }
  0x9d   : > { %3471 = vmatmul.mubr.msk.bf16.gmra.mrb[8].mxu0 %vm447_vm3, %v3126_v52  ;;  %v3140_v52 = vld [vmem:[%s3822_s5 + $0x3c] sm:$0xe]  ;;  %v2465_v4 = vrot.slane %v2463_v31, 4  ;;  %v1330_v47 = vrot.slane %v1328_v39, 5  ;;  %v2473_v58 = vrot.slane %v4423_v63, 5  ;;  %v2477_v63 = vrot.slane %v4408_v27, 5 }
  0x9e   : > { %3474 = vmatprep.mubr.msk.bf16.mxu0 %vm447_vm3, %v3127_v18  ;;  %v3148_v45 = vrot.slane %v3140_v52, 9  ;;  %v3156_v18 = vcombine.low %v2457_v21, %v2460_v55  ;;  %v1326_v49 = vrot.slane %v1325_v10, 4  ;;  %v1359_v46 = vrot.slane %v1357_v15, 4  ;;  %v3143_v27 = vld [vmem:[%s3822_s5 + $0x60] sm:$0xe] }
  0x9f   : > { %3391 = vmatmul.mubr.msk.bf16.vlgmr.msra.gmra.mrb[0].mxu1 %vm447_vm3, %v3694_v59  ;;  %v1370_v59 = vshrl.u32 %v4148_v17, 16  ;;  %v1362_v54 = vrot.slane %v1360_v41, 5  ;;  %v1368_v48 = vrot.slane %v1366_v40, 5  ;;  %v2467_v29 = vsel %vm4016_vm7, %v2465_v4, %v2466_v11  ;;  %v3700_v52 = vld [vmem:[%s3822_s5 + $0x60] sm:$0xff]  }
  0xa0   : > { %3497 = vmatpush3.bf16.msra.mxu1 %v3804_v3  ;;  %3394 = vmatprep.mubr.msk.bf16.mxu1 %vm447_vm3, %v3695_v51  ;;  %v4564_v3 = vcombine.low %v1345_v9, %v1355_v44  ;;  %v2470_v44 = vrot.slane %v4387_v16, 5  ;;  %v3149_v51 = vrot.slane %v3141_v38, 9  ;;  %v1316_v16 = vrot.slane %v1315_v19, 4  ;;  %v4732_v9 = vld [vmem:[#allocation3_spill] sm:$0xff] }
  0xa1   : > { %v1372_v62 = vrot.slane %v1370_v59, 4  ;;  %v2464_v17 = vsel %vm4016_vm7, %v3148_v45, %v2463_v31  ;;  %v1331_v1 = vsel %vm3861_vm4, %v1326_v49, %v1330_v47  ;;  %v1381_v34 = vshrl.u32 %v3008_v50, 16  ;;  %v3144_v47 = vld [vmem:[%s3822_s5 + $0x6c] sm:$0xe]  ;;  %s4672_s5 = scalar_lea.vmem %s4712_s3, %s2890_s12 }
  0xa2   : > { %v2472_v30 = vrot.slane %v2470_v44, 4  ;;  %v2471_v35 = vsel %vm4016_vm7, %v3149_v51, %v2470_v44  ;;  %v1321_v14 = vsel %vm3861_vm4, %v1316_v16, %v4567_v25  ;;  %v1384_v2 = vshll.u32 %v3008_v50, 16 }
  0xa3   : > { %v1394_v6 = vshrl.u32 %v4732_v9, 16  ;;  %v3157_v42 = vcombine.low %v2464_v17, %v2467_v29  ;;  %v1373_v7 = vor.u32 %v1372_v62, %v1368_v48  ;;  %v1376_v25 = vshll.u32 %v4733_v33, 16 }
  0xa4   : > { %v2474_v13 = vsel %vm4016_vm7, %v2472_v30, %v2473_v58  ;;  %v2479_v53 = vrot.slane %v2477_v63, 4  ;;  %v2480_v57 = vrot.slane %v4461_v56, 5  ;;  %v3016_v21 = vcombine.low %v1321_v14, %v1331_v1 }
  0xa5   : > { %3475 = vmatmul.mubr.msk.bf16.gmra.mrb[12].mxu0 %vm447_vm3, %v3128_v61  ;;  %v1390_v61 = vshll.u32 %v4732_v9, 16  ;;  %v3158_v36 = vcombine.low %v2471_v35, %v2474_v13  ;;  %v3151_v31 = vrot.slane %v3143_v27, 9  ;;  %v2487_v26 = vrot.slane %v4482_v28, 5 }
  0xa6   : > { %3480 = vmatprep.mubr.msk.bf16.mxu0 %vm447_vm3, %v3154_v0  ;;  %v2484_v0 = vrot.slane %v4731_v8, 5  ;;  %v1383_v55 = vrot.slane %v1381_v34, 4  ;;  %v1386_v19 = vrot.slane %v1384_v2, 5  ;;  %v1396_v38 = vrot.slane %v1394_v6, 4 }
  0xa7   : > { %3395 = vmatmul.mubr.msk.bf16.gmra.mrb[4].mxu1 %vm447_vm3, %v3696_v22  ;;  %v1363_v22 = vor.u32 %v1362_v54, %v1359_v46  ;;  %v1392_v10 = vrot.slane %v1390_v61, 5  ;;  %v1378_v45 = vrot.slane %v1376_v25, 5  ;;  %v2481_v28 = vsel %vm4016_vm7, %v2479_v53, %v2480_v57 }
  0xa8   : > { %3398 = vmatprep.mubr.msk.bf16.mxu1 %vm447_vm3, %v3697_v20  ;;  %v3150_v20 = vrot.slane %v3142_v24, 9  ;;  %v2486_v39 = vrot.slane %v2484_v0, 4  ;;  %v2485_v11 = vsel %vm4016_vm7, %v3151_v31, %v2484_v0  ;;  %v2491_v15 = vrot.slane %v4470_v12, 5  ;;  %v4663_v0 = vld [vmem:[%s4711_s2] ss:$0 sm:$0xff] }
  0xa9   : > { %v1364_v44 = vrot.slane %v1363_v22, 4  ;;  %v1387_v40 = vor.u32 %v1386_v19, %v1383_v55  ;;  %v1397_v59 = vor.u32 %v1396_v38, %v1392_v10  ;;  %v3152_v30 = vrot.slane %v3144_v47, 9 }
  0xaa   : > { %v2478_v56 = vsel %vm4016_vm7, %v3150_v20, %v2477_v63  ;;  %v2488_v41 = vsel %vm4016_vm7, %v2486_v39, %v2487_v26  ;;  %v2493_v12 = vrot.slane %v2491_v15, 4  ;;  %v2494_v58 = vrot.slane %v4511_v60, 5 }
  0xab   : > { %v1369_v51 = vsel %vm3861_vm4, %v1364_v44, %v1368_v48  ;;  %v3159_v16 = vcombine.low %v2478_v56, %v2481_v28  ;;  %v3160_v49 = vcombine.low %v2485_v11, %v2488_v41  ;;  %v1388_v46 = vrot.slane %v1387_v40, 4 }
  0xac   : > { %v1398_v54 = vrot.slane %v1397_v59, 4  ;;  %v2492_v48 = vsel %vm4016_vm7, %v3152_v30, %v2491_v15  ;;  %v2495_v50 = vsel %vm4016_vm7, %v2493_v12, %v2494_v58 }
  0xad   : > { %3481 = vmatmul.mubr.msk.bf16.vlgmr.msra.gmra.mrb[0].mxu0 %vm447_vm3, %v3155_v43  ;;  %v1374_v43 = vrot.slane %v1373_v7, 4  ;;  %v1393_v60 = vsel %vm3861_vm4, %v1388_v46, %v1392_v10  ;;  %v3161_v29 = vcombine.low %v2492_v48, %v2495_v50 }
  0xae   : > { %3484 = vmatprep.mubr.msk.bf16.mxu0 %vm447_vm3, %v3156_v18  ;;  %v4734_v18 = vld [vmem:[#allocation4_spill] sm:$0xff] }
  0xaf   : > { %3399 = vmatmul.mubr.msk.bf16.gmra.mrb[8].mxu1 %vm447_vm3, %v3698_v37  ;;  %v1400_v4 = vshll.u32 %v4734_v18, 16  ;;  %v1379_v37 = vsel %vm3861_vm4, %v1374_v43, %v1378_v45 }
  0xb0   : > { %3402 = vmatprep.mubr.msk.bf16.mxu1 %vm447_vm3, %v3699_v23  ;;  %v3018_v23 = vcombine.low %v1369_v51, %v1379_v37 }
  0xb1   : > { %v1402_v62 = vrot.slane %v1400_v4, 5 }
  0xb3   : > { %v1403_v17 = vsel %vm3861_vm4, %v1398_v54, %v1402_v62 }
  0xb4   : > { %v3019_v35 = vcombine.low %v1393_v60, %v1403_v17 }
  0xb5   : > { %3485 = vmatmul.mubr.msk.bf16.gmra.mrb[4].mxu0 %vm447_vm3, %v3157_v42 }
  0xb6   : > { %3488 = vmatprep.mubr.msk.bf16.mxu0 %vm447_vm3, %v3158_v36 }
  0xb7   : > { %3403 = vmatmul.mubr.msk.bf16.gmra.mrb[12].mxu1 %vm447_vm3, %v3700_v52 }
  0xb8   : > { %3416 = vmatprep.mubr.msk.bf16.mxu1 %vm447_vm3, %v3016_v21 }
  0xbd   : > { %3489 = vmatmul.mubr.msk.bf16.gmra.mrb[8].mxu0 %vm447_vm3, %v3159_v16 }
  0xbe   : > { %3492 = vmatprep.mubr.msk.bf16.mxu0 %vm447_vm3, %v3160_v49 }
  0xbf   : > { %3417 = vmatmul.mubr.msk.bf16.vlgmr.msra.gmra.mrb[8].mxu1 %vm447_vm3, %v4564_v3 }
  0xc0   : > { %3420 = vmatprep.mubr.msk.bf16.mxu1 %vm447_vm3, %v3018_v23 }
  0xc5   : > { %3493 = vmatmul.mubr.msk.bf16.gmra.mrb[12].mxu0 %vm447_vm3, %v3161_v29 }
  0xc7   : > { %3421 = vmatmul.mubr.msk.bf16.gmra.mrb[12].mxu1 %vm447_vm3, %v3019_v35 }
 0x172   : > { %v3392_v3 = vpop.f32.mrb[0].mxu1 }
 0x173   : > { %v1109_v63 = vpop.f32.mrb[1].mxu1 }
 0x174   : > { %v3393_v14 = vpop.f32.mrb[2].mxu1 }
 0x175   : > { %v1112_v5 = vpop.f32.mrb[3].mxu1 }
 0x17a   : > { %v3396_v1 = vpop.f32.mrb[4].mxu1 }
 0x17b   : > { %v1125_v13 = vpop.f32.mrb[5].mxu1 }
 0x17c   : > { %v3397_v24 = vpop.f32.mrb[6].mxu1 }
 0x17d   : > { %v1128_v8 = vpop.f32.mrb[7].mxu1 }
 0x180   : > { %v3482_v32 = vpop.f32.mrb[0].mxu0 }
 0x181   : > { %v3498_v27 = vadd.f32 %v3482_v32, %v3392_v3  ;;  %v2583_v34 = vpop.f32.mrb[1].mxu0 }
 0x182   : > { %v3499_v2 = vadd.f32 %v2583_v34, %v1109_v63  ;;  %v3483_v9 = vpop.f32.mrb[2].mxu0 }
 0x183   : > { %v2671_v61 = vadd.f32 %v3498_v27, %v4663_v0  ;;  %v3500_v6 = vadd.f32 %v3483_v9, %v3393_v14  ;;  %v2586_v42 = vpop.f32.mrb[3].mxu0 }
 0x184   : > { %v2669_v22 = vadd.f32 %v3499_v2, %v4663_v0  ;;  %v3501_v7 = vadd.f32 %v2586_v42, %v1112_v5 }
 0x185   : > { %v2672_v33 = vadd.f32 %v3500_v6, %v4663_v0  ;;  %v2687_v36 = vmax.f32 %v2671_v61, 0.0 }
 0x186   : > { %v2670_v25 = vadd.f32 %v3501_v7, %v4663_v0  ;;  %v2685_v53 = vmax.f32 %v2669_v22, 0.0 }
 0x187   : > { %v2688_v20 = vmax.f32 %v2672_v33, 0.0 }
 0x188   : > { %v2686_v57 = vmax.f32 %v2670_v25, 0.0  ;;  %v3486_v52 = vpop.f32.mrb[4].mxu0 }
 0x189   : > { %v3214_v21 = vpack.c.bf16 %v2688_v20, %v2687_v36  ;;  %v3502_v31 = vadd.f32 %v3486_v52, %v3396_v1  ;;  %v2599_v39 = vpop.f32.mrb[5].mxu0 }
 0x18a   : > { %v3209_v26 = vpack.c.bf16 %v2686_v57, %v2685_v53  ;;  %v3503_v55 = vadd.f32 %v2599_v39, %v1125_v13  ;;  %v3487_v19 = vpop.f32.mrb[6].mxu0 }
 0x18b   : > { %3246 = vst [vmem:[%s4672_s5 + $0x8] sm:$0xff] %v3214_v21   ;;  %v2675_v10 = vadd.f32 %v3502_v31, %v4663_v0  ;;  %v3504_v38 = vadd.f32 %v3487_v19, %v3397_v24  ;;  %v2602_v44 = vpop.f32.mrb[7].mxu0 }
 0x18c   : > { %3210 = vst [vmem:[%s4672_s5] sm:$0xff] %v3209_v26   ;;  %v2673_v43 = vadd.f32 %v3503_v55, %v4663_v0  ;;  %v3505_v45 = vadd.f32 %v2602_v44, %v1128_v8 }
 0x18d   : > { %v2676_v56 = vadd.f32 %v3504_v38, %v4663_v0  ;;  %v2691_v11 = vmax.f32 %v2675_v10, 0.0 }
 0x18e   : > { %v2674_v28 = vadd.f32 %v3505_v45, %v4663_v0  ;;  %v2689_v41 = vmax.f32 %v2673_v43, 0.0 }
 0x18f   : > { %v2692_v15 = vmax.f32 %v2676_v56, 0.0 }
 0x190   : > { %v2690_v40 = vmax.f32 %v2674_v28, 0.0  ;;  %v3490_v59 = vpop.f32.mrb[8].mxu0 }
 0x191   : > { %v3224_v18 = vpack.c.bf16 %v2692_v15, %v2691_v11  ;;  %v2615_v47 = vpop.f32.mrb[9].mxu0 }
 0x192   : > { %v3418_v4 = vpop.f32.mrb[8].mxu1  ;;  %v3219_v51 = vpack.c.bf16 %v2690_v40, %v2689_v41  ;;  %v3491_v49 = vpop.f32.mrb[10].mxu0 }
 0x193   : > { %v3506_v37 = vadd.f32 %v3490_v59, %v3418_v4  ;;  %v1523_v16 = vpop.f32.mrb[9].mxu1  ;;  %3248 = vst [vmem:[%s4672_s5 + $0x18] sm:$0xff] %v3224_v18   ;;  %v2618_v58 = vpop.f32.mrb[11].mxu0 }
 0x194   : > { %v3507_v30 = vadd.f32 %v2615_v47, %v1523_v16  ;;  %v3419_v12 = vpop.f32.mrb[10].mxu1  ;;  %3247 = vst [vmem:[%s4672_s5 + $0x10] sm:$0xff] %v3219_v51  }
 0x195   : > { %v2679_v23 = vadd.f32 %v3506_v37, %v4663_v0  ;;  %v3508_v46 = vadd.f32 %v3491_v49, %v3419_v12  ;;  %v1526_v54 = vpop.f32.mrb[11].mxu1 }
 0x196   : > { %v2677_v62 = vadd.f32 %v3507_v30, %v4663_v0  ;;  %v3509_v48 = vadd.f32 %v2618_v58, %v1526_v54 }
 0x197   : > { %v2680_v50 = vadd.f32 %v3508_v46, %v4663_v0  ;;  %v2695_v17 = vmax.f32 %v2679_v23, 0.0 }
 0x198   : > { %v2678_v60 = vadd.f32 %v3509_v48, %v4663_v0  ;;  %v3494_v35 = vpop.f32.mrb[12].mxu0  ;;  %v2693_v3 = vmax.f32 %v2677_v62, 0.0 }
 0x199   : > { %v2696_v29 = vmax.f32 %v2680_v50, 0.0  ;;  %v2631_v5 = vpop.f32.mrb[13].mxu0 }
 0x19a   : > { %v2694_v63 = vmax.f32 %v2678_v60, 0.0  ;;  %v3422_v14 = vpop.f32.mrb[12].mxu1  ;;  %v3495_v8 = vpop.f32.mrb[14].mxu0 }
 0x19b   : > { %v3234_v1 = vpack.c.bf16 %v2696_v29, %v2695_v17  ;;  %v3510_v13 = vadd.f32 %v3494_v35, %v3422_v14  ;;  %v1539_v24 = vpop.f32.mrb[13].mxu1  ;;  %v2634_v2 = vpop.f32.mrb[15].mxu0 }
 0x19c   : > { %v3229_v32 = vpack.c.bf16 %v2694_v63, %v2693_v3  ;;  %v3511_v27 = vadd.f32 %v2631_v5, %v1539_v24  ;;  %v3423_v34 = vpop.f32.mrb[14].mxu1 }
 0x19d   : > { %3250 = vst [vmem:[%s4672_s5 + $0x28] sm:$0xff] %v3234_v1   ;;  %v2683_v9 = vadd.f32 %v3510_v13, %v4663_v0  ;;  %v3512_v61 = vadd.f32 %v3495_v8, %v3423_v34  ;;  %v1542_v6 = vpop.f32.mrb[15].mxu1 }
 0x19e   : > { %3249 = vst [vmem:[%s4672_s5 + $0x20] sm:$0xff] %v3229_v32   ;;  %v2681_v42 = vadd.f32 %v3511_v27, %v4663_v0  ;;  %v3513_v22 = vadd.f32 %v2634_v2, %v1542_v6 }
 0x19f   : > { %v2684_v7 = vadd.f32 %v3512_v61, %v4663_v0  ;;  %v2699_v25 = vmax.f32 %v2683_v9, 0.0 }
 0x1a0   : > { %v2682_v33 = vadd.f32 %v3513_v22, %v4663_v0  ;;  %v2697_v20 = vmax.f32 %v2681_v42, 0.0 }
 0x1a1   : > { %v2700_v36 = vmax.f32 %v2684_v7, 0.0 }
 0x1a2   : > { %v2698_v53 = vmax.f32 %v2682_v33, 0.0 }
 0x1a3   : > { %v3244_v57 = vpack.c.bf16 %v2700_v36, %v2699_v25 }
 0x1a4   : > { %v3239_v52 = vpack.c.bf16 %v2698_v53, %v2697_v20 }
 0x1a5   : > { %3252 = vst [vmem:[%s4672_s5 + $0x38] sm:$0xff] %v3244_v57  }
 0x1a6   : > { %3251 = vst [vmem:[%s4672_s5 + $0x30] sm:$0xff] %v3239_v52  }
 0x1a7 PF: > { %s13_s16 = sadd.s32 1, %s3740_s16   ;;  %s4735_s12 = smov %s3732_s14 }
 0x1a8   : > { %p10_p7 = scmp.ge.s32.totalorder %s13_s16, 6   ;;  %s4736_s13 = smov %s3736_s15 }
 0x1a9   : > { %s4737_s14 = smov %s4740_s17  ;;  %s4738_s15 = smov %s4744_s18 }
 0x1aa   :  { %12 = sbr.rel (!%p10_p7) target bundleno = 3 (0x3), region = 73 }

</bundles_post_ra>
